<compile_context>
chip_gen: v7x
topology: tpu7x:2x2x1
jax: 0.10.0
libtpu: 0.0.40
codegen_flags: <defaults>
</compile_context>

<pallas_src>
import functools
import numpy as np
import jax
import jax.numpy as jnp
from jax.experimental import pallas as pl
from jax.experimental.pallas import tpu as pltpu

LN_EPS = 1e-12          # BERT LayerNorm eps
MASK_NEG = -10000.0     # HF extended_attention_mask fill value


# --------------------------------------------------------------------------
# Generation-aware tiling configuration
# --------------------------------------------------------------------------
def _tpu_info():
    try:
        return pltpu.get_tpu_info()
    except Exception:
        return None


_INFO = _tpu_info()
_VMEM_BYTES = int(getattr(_INFO, "vmem_capacity_bytes", 64 * 1024 * 1024)
                  or 64 * 1024 * 1024)
_CHIP_NAME = str(getattr(_INFO, "chip_version", "")).lower()
_IS_V5 = "v5" in _CHIP_NAME
_BIG_VMEM = _VMEM_BYTES >= 100 * 1024 * 1024           # v5e / v6e: 128 MiB

if not _BIG_VMEM:
    # v7x: 64 MiB physical VMEM, 2 TensorCores, 3.2 TB/s HBM.
    # Raise the scoped limit well past the 32 MiB default but keep headroom.
    _VMEM_LIMIT = min(48 * 1024 * 1024, int(_VMEM_BYTES * 3 // 4))
    _M_TILES = (512, 256, 128)                         # keep M/tm >= 2 for 2 TCs
    _N_TILES = (3072, 2304, 1536, 1152, 768, 512, 384, 256, 128)
    _K_TILES = (768, 512, 384, 256, 128)
elif _IS_V5:
    # v5e: compute-bound (~197 TF/s vs 820 GB/s); don't chase huge tiles,
    # keep lane-dense, 128-aligned tiles with modest VMEM pressure.
    _VMEM_LIMIT = 64 * 1024 * 1024
    _M_TILES = (512, 256, 128)
    _N_TILES = (2304, 1152, 768, 512, 384, 256, 128)
    _K_TILES = (768, 512, 384, 256, 128)
else:
    # v6e (default big-VMEM branch): memory-bound at small tiles, so grow
    # tm/tn (QKV N=2304 and FFN N=3072 now tile at their full widths).
    _VMEM_LIMIT = 64 * 1024 * 1024
    _M_TILES = (1024, 512, 256, 128)
    _N_TILES = (3072, 2304, 1536, 1152, 1024, 768, 512, 384, 256, 128)
    _K_TILES = (1024, 768, 512, 384, 256, 128)

_TILE_BUDGET = int(_VMEM_LIMIT * 0.85)


def _nbytes(shape, dtype):
    return int(np.prod(shape)) * np.dtype(dtype).itemsize


def _pad_rows(x):
    """Pad the leading (row) dim to a multiple of 128 (>=128) or 8 (<128).

    Guarantees a 128-divisible M for large inputs so tile selection never
    silently falls back to one giant full-M block (which would allocate a
    full-M f32 accumulator and defeat pipelining)."""
    M = x.shape[0]
    mult = 128 if M >= 128 else 8
    pad = (-M) % mult
    if pad:
        x = jnp.pad(x, ((0, pad), (0, 0)))
    return x, M


def _mm_tiles(M, N, K, *, n_full=False):
    """Joint (tm, tn, tk) selection under the VMEM budget.

    Accounts for double-buffered bf16 x/w/out tiles, the f32 accumulator and
    (for the fused-LayerNorm kernel, n_full=True) the resident residual tile."""
    m_c = [t for t in _M_TILES if t <= M and M % t == 0] or [M]
    n_c = [N] if n_full else ([t for t in _N_TILES if t <= N and N % t == 0] or [N])
    k_c = [t for t in _K_TILES if t <= K and K % t == 0] or [K]
    fallback = (m_c[-1], n_c[-1], k_c[-1])
    for tm in m_c:                                   # descending preference
        for tn in n_c:
            for tk in k_c:
                vmem = (2 * (tm * tk + tk * tn + tm * tn) * 2   # bf16 dbl-buf
                        + tm * tn * 4)                           # f32 acc
                if n_full:
                    vmem += 2 * tm * tn * 2                      # residual tile
                if vmem <= _TILE_BUDGET:
                    return tm, tn, tk
    return fallback


def _ln_tile(M, H):
    for tm in _M_TILES:
        if tm <= M and M % tm == 0 and (4 * tm * H * 2 + tm * H * 4) <= _TILE_BUDGET:
            return tm
    return M


# --------------------------------------------------------------------------
# Pallas kernels
# --------------------------------------------------------------------------
def _dense_kernel(x_ref, w_ref, b_ref, o_ref, acc_ref, *, activation):
    """Tiled o = act(x @ w + b); grid (M/tm, N/tn, K/tk); acc in f32 VMEM."""
    k = pl.program_id(2)

    @pl.when(k == 0)
    def _():
        acc_ref[...] = jnp.zeros_like(acc_ref)

    acc_ref[...] += jnp.dot(x_ref[...], w_ref[...],
                            preferred_element_type=jnp.float32)

    @pl.when(k == pl.num_programs(2) - 1)
    def _():
        y = acc_ref[...] + b_ref[...]
        if activation == "gelu":
            # tanh-approximate GELU (EUP tanh instead of a long erf polynomial)
            # TODO(synk): HF BERT uses exact erf-GELU; delta is ~1e-3.
            c = np.float32(np.sqrt(2.0 / np.pi))
            y = 0.5 * y * (1.0 + jnp.tanh(c * (y + 0.044715 * y * y * y)))
        o_ref[...] = y.astype(o_ref.dtype)


def dense(x, w, b, activation="none", out_dtype=jnp.bfloat16):
    x, M0 = _pad_rows(x)
    M, K = x.shape
    _, N = w.shape
    tm, tn, tk = _mm_tiles(M, N, K)
    grid = (M // tm, N // tn, K // tk)

    flops = 2 * M * N * K
    trans = M * N if activation == "gelu" else 0
    bytes_accessed = (_nbytes((M, K), x.dtype) + _nbytes((K, N), w.dtype)
                      + _nbytes((N,), jnp.float32) + _nbytes((M, N), out_dtype))

    out = pl.pallas_call(
        functools.partial(_dense_kernel, activation=activation),
        out_shape=jax.ShapeDtypeStruct((M, N), out_dtype),
        grid_spec=pltpu.PrefetchScalarGridSpec(
            num_scalar_prefetch=0,
            grid=grid,
            in_specs=[pl.BlockSpec((tm, tk), lambda i, j, k: (i, k)),
                      pl.BlockSpec((tk, tn), lambda i, j, k: (k, j)),
                      pl.BlockSpec((1, tn), lambda i, j, k: (0, j))],
            out_specs=pl.BlockSpec((tm, tn), lambda i, j, k: (i, j)),
            scratch_shapes=[pltpu.VMEM((tm, tn), jnp.float32)]),
        compiler_params=pltpu.CompilerParams(
            dimension_semantics=("parallel", "parallel", "arbitrary"),
            vmem_limit_bytes=_VMEM_LIMIT),
        cost_estimate=pl.CostEstimate(flops=flops, transcendentals=trans,
                                      bytes_accessed=bytes_accessed),
    )(x, w, b.reshape(1, N))
    return out[:M0] if M0 != M else out


def _dense_res_ln_kernel(x_ref, w_ref, b_ref, r_ref, g_ref, beta_ref,
                         o_ref, acc_ref, *, eps):
    """o = LayerNorm(x @ w + b + residual) * g + beta.
    Grid (M/tm, K/tk); full hidden dim kept per tile (LN over last axis)."""
    k = pl.program_id(1)

    @pl.when(k == 0)
    def _():
        acc_ref[...] = jnp.zeros_like(acc_ref)

    acc_ref[...] += jnp.dot(x_ref[...], w_ref[...],
                            preferred_element_type=jnp.float32)

    @pl.when(k == pl.num_programs(1) - 1)
    def _():
        y = acc_ref[...] + b_ref[...] + r_ref[...].astype(jnp.float32)
        mu = jnp.mean(y, axis=-1, keepdims=True)
        yc = y - mu
        var = jnp.mean(yc * yc, axis=-1, keepdims=True)
        y = yc * jax.lax.rsqrt(var + eps)
        o_ref[...] = (y * g_ref[...] + beta_ref[...]).astype(o_ref.dtype)


def dense_residual_layernorm(x, w, b, residual, gamma, beta,
                             out_dtype=jnp.bfloat16):
    x, M0 = _pad_rows(x)
    residual, _ = _pad_rows(residual)
    M, K = x.shape
    _, N = w.shape                       # N = hidden; kept un-tiled for LN
    tm, _, tk = _mm_tiles(M, N, K, n_full=True)
    grid = (M // tm, K // tk)

    flops = 2 * M * N * K
    bytes_accessed = (_nbytes((M, K), x.dtype) + _nbytes((K, N), w.dtype)
                      + _nbytes((M, N), residual.dtype)
                      + 3 * _nbytes((N,), jnp.float32)
                      + _nbytes((M, N), out_dtype))

    # TODO(synk): residual/gamma/beta are only consumed in the last-k epilogue;
    # pipeline_mode=pl.Buffered(1) on those in_specs would save one buffer of
    # (tm, N) bf16 of VMEM — left out until verified on the installed JAX.
    out = pl.pallas_call(
        functools.partial(_dense_res_ln_kernel, eps=LN_EPS),
        out_shape=jax.ShapeDtypeStruct((M, N), out_dtype),
        grid_spec=pltpu.PrefetchScalarGridSpec(
            num_scalar_prefetch=0,
            grid=grid,
            in_specs=[pl.BlockSpec((tm, tk), lambda i, k: (i, k)),
                      pl.BlockSpec((tk, N), lambda i, k: (k, 0)),
                      pl.BlockSpec((1, N), lambda i, k: (0, 0)),
                      pl.BlockSpec((tm, N), lambda i, k: (i, 0)),
                      pl.BlockSpec((1, N), lambda i, k: (0, 0)),
                      pl.BlockSpec((1, N), lambda i, k: (0, 0))],
            out_specs=pl.BlockSpec((tm, N), lambda i, k: (i, 0)),
            scratch_shapes=[pltpu.VMEM((tm, N), jnp.float32)]),
        compiler_params=pltpu.CompilerParams(
            dimension_semantics=("parallel", "arbitrary"),
            vmem_limit_bytes=_VMEM_LIMIT),
        cost_estimate=pl.CostEstimate(flops=flops, transcendentals=M,
                                      bytes_accessed=bytes_accessed),
    )(x, w, b.reshape(1, N), residual, gamma.reshape(1, N), beta.reshape(1, N))
    return out[:M0] if M0 != M else out


def _ln_kernel(x_ref, g_ref, b_ref, o_ref, *, eps):
    """Residual-free LayerNorm over the last axis (f32 math)."""
    x = x_ref[...].astype(jnp.float32)
    mu = jnp.mean(x, axis=-1, keepdims=True)
    xc = x - mu
    var = jnp.mean(xc * xc, axis=-1, keepdims=True)
    y = xc * jax.lax.rsqrt(var + eps)
    o_ref[...] = (y * g_ref[...] + b_ref[...]).astype(o_ref.dtype)


def layernorm(x, gamma, beta, out_dtype=jnp.bfloat16):
    x, M0 = _pad_rows(x)
    M, H = x.shape
    tm = _ln_tile(M, H)
    bytes_accessed = _nbytes((M, H), x.dtype) + _nbytes((M, H), out_dtype)
    out = pl.pallas_call(
        functools.partial(_ln_kernel, eps=LN_EPS),
        out_shape=jax.ShapeDtypeStruct((M, H), out_dtype),
        grid_spec=pltpu.PrefetchScalarGridSpec(
            num_scalar_prefetch=0,
            grid=(M // tm,),
            in_specs=[pl.BlockSpec((tm, H), lambda i: (i, 0)),
                      pl.BlockSpec((1, H), lambda i: (0, 0)),
                      pl.BlockSpec((1, H), lambda i: (0, 0))],
            out_specs=pl.BlockSpec((tm, H), lambda i: (i, 0))),
        compiler_params=pltpu.CompilerParams(
            dimension_semantics=("parallel",),
            vmem_limit_bytes=_VMEM_LIMIT),
        cost_estimate=pl.CostEstimate(flops=8 * M * H, transcendentals=M,
                                      bytes_accessed=bytes_accessed),
    )(x, gamma.reshape(1, H), beta.reshape(1, H))
    return out[:M0] if M0 != M else out


def _attention_kernel(qkv_ref, m_ref, o_ref, *, n_heads, head_dim, hidden,
                      scale):
    """Per-batch attention over the fused QKV block.

    qkv block: [1, S, 3H] bf16 (Q | K | V along the last axis), resident in
    VMEM; mask block: [1, 1, S] f32 (broadcast over query rows).  Heads are a
    static unrolled loop; all per-head contexts are concatenated and written
    once as a lane-dense (S, H) output block."""
    mask = m_ref[0]                                   # (1, S) f32
    ctxs = []
    for h in range(n_heads):                          # static unroll
        lo = h * head_dim
        q = qkv_ref[0, :, pl.ds(lo, head_dim)]                    # (S, hd)
        k = qkv_ref[0, :, pl.ds(hidden + lo, head_dim)]           # (S, hd)
        v = qkv_ref[0, :, pl.ds(2 * hidden + lo, head_dim)]       # (S, hd)
        s = jnp.dot(q, k.T, preferred_element_type=jnp.float32)   # (S, S)
        s = s * scale + mask                          # per-key additive mask
        mx = jnp.max(s, axis=-1, keepdims=True)       # keep max-subtraction!
        p = jnp.exp(s - mx)
        denom = jnp.sum(p, axis=-1, keepdims=True)
        p = p * pl.reciprocal(denom, approx=True)
        ctxs.append(jnp.dot(p.astype(v.dtype), v,
                            preferred_element_type=jnp.float32))
    ctx = jnp.concatenate(ctxs, axis=-1)              # (S, H) lane-dense
    o_ref[...] = ctx[None].astype(o_ref.dtype)


def attention(qkv_bse, mask_b1s, n_heads, scale):
    """softmax((Q K^T) * scale + mask) V for every (batch, head).

    grid=(B,) ('parallel' -> megacore sharding on v7x); no head-split HBM
    relayouts and no materialized [B*heads, S, S] mask in HBM."""
    B, S, threeH = qkv_bse.shape
    H = threeH // 3
    hd = H // n_heads
    flops = 4 * B * S * S * H
    bytes_accessed = (_nbytes((B, S, threeH), qkv_bse.dtype)
                      + _nbytes((B, S, H), jnp.bfloat16)
                      + _nbytes(mask_b1s.shape, jnp.float32))
    return pl.pallas_call(
        functools.partial(_attention_kernel, n_heads=n_heads, head_dim=hd,
                          hidden=H, scale=scale),
        out_shape=jax.ShapeDtypeStruct((B, S, H), jnp.bfloat16),
        grid_spec=pltpu.PrefetchScalarGridSpec(
            num_scalar_prefetch=0,
            grid=(B,),
            in_specs=[pl.BlockSpec((1, S, threeH), lambda b: (b, 0, 0)),
                      pl.BlockSpec((1, 1, S), lambda b: (b, 0, 0))],
            out_specs=pl.BlockSpec((1, S, H), lambda b: (b, 0, 0))),
        compiler_params=pltpu.CompilerParams(
            dimension_semantics=("parallel",),
            vmem_limit_bytes=_VMEM_LIMIT),
        cost_estimate=pl.CostEstimate(flops=flops,
                                      transcendentals=B * n_heads * S * S,
                                      bytes_accessed=bytes_accessed),
    )(qkv_bse, mask_b1s)
    # TODO(synk): for very long S a flash-style KV-tiled online softmax would
    # avoid the (S,S) score block entirely; unnecessary at BERT S<=512.


def _pooler_head_kernel(cls_ref, pw_ref, pb_ref, cw_ref, cb_ref, o_ref):
    """Fused BERT pooler + classifier: logits = tanh(cls @ Wp + bp) @ Wc + bc.
    Whole-array kernel (both matmuls are microscopic); dropout(p=0) = id."""
    pooled = jnp.dot(cls_ref[...], pw_ref[...],
                     preferred_element_type=jnp.float32) + pb_ref[...]
    pooled = jnp.tanh(pooled)
    logits = jnp.dot(pooled.astype(cw_ref.dtype), cw_ref[...],
                     preferred_element_type=jnp.float32) + cb_ref[...]
    o_ref[...] = logits.astype(o_ref.dtype)


def pooler_classifier(cls_tok, pool_w, pool_b, cls_w, cls_b):
    B, H = cls_tok.shape
    NL = cls_w.shape[1]
    flops = 2 * B * H * H + 2 * B * H * NL
    bytes_accessed = (_nbytes((B, H), cls_tok.dtype) + _nbytes((H, H), pool_w.dtype)
                      + _nbytes((H, NL), cls_w.dtype) + _nbytes((B, NL), jnp.float32))
    return pl.pallas_call(
        _pooler_head_kernel,
        out_shape=jax.ShapeDtypeStruct((B, NL), jnp.float32),
        grid_spec=pltpu.PrefetchScalarGridSpec(
            num_scalar_prefetch=0,
            grid=(1,),
            in_specs=[pl.BlockSpec((B, H), lambda i: (0, 0)),
                      pl.BlockSpec((H, H), lambda i: (0, 0)),
                      pl.BlockSpec((1, H), lambda i: (0, 0)),
                      pl.BlockSpec((H, NL), lambda i: (0, 0)),
                      pl.BlockSpec((1, NL), lambda i: (0, 0))],
            out_specs=pl.BlockSpec((B, NL), lambda i: (0, 0))),
        compiler_params=pltpu.CompilerParams(
            dimension_semantics=("arbitrary",),
            vmem_limit_bytes=_VMEM_LIMIT),
        cost_estimate=pl.CostEstimate(flops=flops, transcendentals=B * H,
                                      bytes_accessed=bytes_accessed),
    )(cls_tok, pool_w, pool_b.reshape(1, H), cls_w, cls_b.reshape(1, NL))


# --------------------------------------------------------------------------
# Parameter construction (deterministic, synthetic — no checkpoint load)
# --------------------------------------------------------------------------
def init_params(key, cfg):
    def nrm(k, shape, dtype=jnp.bfloat16):
        return (jax.random.normal(k, shape, jnp.float32) * 0.02).astype(dtype)

    H, I, V, P, T, L, NL = (cfg["hidden"], cfg["intermediate"], cfg["vocab"],
                            cfg["max_pos"], cfg["type_vocab"], cfg["layers"],
                            cfg["n_labels"])
    keys = iter(jax.random.split(key, 8 + 8 * L))
    params = {
        # embedding tables in bf16 (halves gather + LN-input HBM traffic;
        # LayerNorm math is done in f32 inside the kernel)
        "word_emb": nrm(next(keys), (V, H)),
        "pos_emb": nrm(next(keys), (P, H)),
        "type_emb": nrm(next(keys), (T, H)),
        "emb_ln_g": jnp.ones((H,), jnp.float32),
        "emb_ln_b": jnp.zeros((H,), jnp.float32),
        # matmul weights in bf16 (MXU), biases / LN params in f32
        "pool_w": nrm(next(keys), (H, H)),
        "pool_b": jnp.zeros((H,), jnp.float32),
        "cls_w": nrm(next(keys), (H, NL)),
        "cls_b": jnp.zeros((NL,), jnp.float32),
        "layers": [],
    }
    for _ in range(L):
        layer = {
            # fused Q|K|V projection: [H, 3H] (column blocks = Q, K, V)
            "qkv_w": nrm(next(keys), (H, 3 * H)),
            "qkv_b": jnp.zeros((3 * H,), jnp.float32),
            "o_w": nrm(next(keys), (H, H)),
            "o_b": jnp.zeros((H,), jnp.float32),
            "ln1_g": jnp.ones((H,), jnp.float32),
            "ln1_b": jnp.zeros((H,), jnp.float32),
            "w1": nrm(next(keys), (H, I)), "b1": jnp.zeros((I,), jnp.float32),
            "w2": nrm(next(keys), (I, H)), "b2": jnp.zeros((H,), jnp.float32),
            "ln2_g": jnp.ones((H,), jnp.float32),
            "ln2_b": jnp.zeros((H,), jnp.float32),
        }
        params["layers"].append(layer)
    return params


# --------------------------------------------------------------------------
# Forward pass (mirrors BertClassifier.forward)
# --------------------------------------------------------------------------
def bert_classifier_forward(params, input_id, mask, token_ids, cfg):
    B, S = input_id.shape
    H = cfg["hidden"]
    nH = cfg["heads"]
    scale = 1.0 / float(np.sqrt(H // nH))

    # ---- embeddings (gather = glue) + residual-free Pallas LayerNorm -------
    emb = (params["word_emb"][input_id]
           + params["pos_emb"][:S][None, :, :]
           + params["type_emb"][token_ids])                      # [B,S,H] bf16
    x = layernorm(emb.reshape(B * S, H),
                  params["emb_ln_g"], params["emb_ln_b"])        # bf16

    # ---- additive attention mask, kept tiny: [B,1,S] (broadcast in-kernel) --
    mask_add = ((1.0 - mask.astype(jnp.float32)) * MASK_NEG).reshape(B, 1, S)

    # ---- transformer encoder ------------------------------------------------
    # dropout layers (attention probs / hidden) are identity in eval mode.
    for lp in params["layers"]:
        qkv = dense(x, lp["qkv_w"], lp["qkv_b"])                 # [B*S,3H] bf16
        # free reshape (no head-split transposes); attention loops heads in-VMEM
        ctx = attention(qkv.reshape(B, S, 3 * H), mask_add, nH, scale)
        ctx = ctx.reshape(B * S, H)                              # free reshape
        # output projection + bias + residual + LayerNorm fused in one kernel
        x = dense_residual_layernorm(ctx, lp["o_w"], lp["o_b"],
                                     x, lp["ln1_g"], lp["ln1_b"])

        h1 = dense(x, lp["w1"], lp["b1"], activation="gelu")     # [B*S,I]
        # FFN down projection + bias + residual + LayerNorm fused
        x = dense_residual_layernorm(h1, lp["w2"], lp["b2"],
                                     x, lp["ln2_g"], lp["ln2_b"])

    # ---- pooler + dropout(p=0, identity) + classifier head, fused -----------
    cls_tok = x.reshape(B, S, H)[:, 0, :]                        # [B,H] bf16
    logits = pooler_classifier(cls_tok, params["pool_w"], params["pool_b"],
                               params["cls_w"], params["cls_b"])
    return logits                                                # [B,n_labels]


# --------------------------------------------------------------------------
if __name__ == "__main__":
    cfg = dict(hidden=32, heads=4, intermediate=64, layers=2,
               vocab=100, max_pos=16, type_vocab=2, n_labels=3)
    B, S = 2, 8

    key = jax.random.PRNGKey(0)
    k_param, k_ids, k_type = jax.random.split(key, 3)

    params = init_params(k_param, cfg)

    input_id = jax.random.randint(k_ids, (B, S), 0, cfg["vocab"], jnp.int32)
    token_ids = jax.random.randint(k_type, (B, S), 0, cfg["type_vocab"],
                                   jnp.int32)
    # attention mask: batch 0 fully valid, batch 1 has the last 2 tokens padded
    mask = jnp.array([[1, 1, 1, 1, 1, 1, 1, 1],
                      [1, 1, 1, 1, 1, 1, 0, 0]], dtype=jnp.int32)

    fwd = jax.jit(functools.partial(bert_classifier_forward, cfg=cfg))
    logits = fwd(params, input_id, mask, token_ids)
    jax.block_until_ready(logits)

    assert logits.shape == (B, cfg["n_labels"])
    assert bool(jnp.all(jnp.isfinite(logits)))
    print("KERNEL_OK")
</pallas_src>

<mosaic_0001>
module attributes {stable_mosaic.version = 11 : i64} {
  func.func @_ln_kernel(%arg0: i32, %arg1: memref<16x32xbf16, #tpu.memory_space<vmem>>, %arg2: memref<1x32xf32, #tpu.memory_space<vmem>>, %arg3: memref<1x32xf32, #tpu.memory_space<vmem>>, %arg4: memref<16x32xbf16, #tpu.memory_space<vmem>>) attributes {dimension_semantics = [#tpu.dimension_semantics<parallel>], iteration_bounds = array<i64: 1>, scalar_prefetch = 0 : i64, scratch_operands = 0 : i64, tpu.core_type = #tpu.core_type<tc>, window_params = [{transform_indices = @transform_0, window_bounds = array<i64: 16, 32>}, {pipeline_mode = #tpu.pipeline_mode<synchronous>, transform_indices = @transform_1, window_bounds = array<i64: 1, 32>}, {pipeline_mode = #tpu.pipeline_mode<synchronous>, transform_indices = @transform_2, window_bounds = array<i64: 1, 32>}, {transform_indices = @transform_3, window_bounds = array<i64: 16, 32>}]} {
    %c0 = arith.constant 0 : index
    %c0_0 = arith.constant 0 : index
    %0 = vector.load %arg1[%c0, %c0_0] : memref<16x32xbf16, #tpu.memory_space<vmem>>, vector<16x32xbf16>
    %1 = arith.extf %0 : vector<16x32xbf16> to vector<16x32xf32>
    %cst = arith.constant dense<0.000000e+00> : vector<16xf32>
    %2 = vector.multi_reduction <add>, %1, %cst [1] : vector<16x32xf32> to vector<16xf32>
    %3 = vector.shape_cast %2 : vector<16xf32> to vector<16x1xf32>
    %cst_1 = arith.constant 3.200000e+01 : f32
    %4 = vector.broadcast %cst_1 : f32 to vector<16x1xf32>
    %5 = arith.divf %3, %4 : vector<16x1xf32>
    %6 = vector.broadcast %5 : vector<16x1xf32> to vector<16x32xf32>
    %7 = arith.subf %1, %6 : vector<16x32xf32>
    %8 = arith.mulf %7, %7 : vector<16x32xf32>
    %cst_2 = arith.constant dense<0.000000e+00> : vector<16xf32>
    %9 = vector.multi_reduction <add>, %8, %cst_2 [1] : vector<16x32xf32> to vector<16xf32>
    %10 = vector.shape_cast %9 : vector<16xf32> to vector<16x1xf32>
    %cst_3 = arith.constant 3.200000e+01 : f32
    %11 = vector.broadcast %cst_3 : f32 to vector<16x1xf32>
    %12 = arith.divf %10, %11 : vector<16x1xf32>
    %cst_4 = arith.constant 9.99999996E-13 : f32
    %13 = vector.broadcast %cst_4 : f32 to vector<16x1xf32>
    %14 = arith.addf %12, %13 : vector<16x1xf32>
    %15 = math.rsqrt %14 : vector<16x1xf32>
    %16 = vector.broadcast %15 : vector<16x1xf32> to vector<16x32xf32>
    %17 = arith.mulf %7, %16 : vector<16x32xf32>
    %c0_5 = arith.constant 0 : index
    %c0_6 = arith.constant 0 : index
    %18 = vector.load %arg2[%c0_5, %c0_6] : memref<1x32xf32, #tpu.memory_space<vmem>>, vector<1x32xf32>
    %19 = vector.broadcast %18 : vector<1x32xf32> to vector<16x32xf32>
    %20 = arith.mulf %17, %19 : vector<16x32xf32>
    %c0_7 = arith.constant 0 : index
    %c0_8 = arith.constant 0 : index
    %21 = vector.load %arg3[%c0_7, %c0_8] : memref<1x32xf32, #tpu.memory_space<vmem>>, vector<1x32xf32>
    %22 = vector.broadcast %21 : vector<1x32xf32> to vector<16x32xf32>
    %23 = arith.addf %20, %22 : vector<16x32xf32>
    %24 = arith.truncf %23 : vector<16x32xf32> to vector<16x32xbf16>
    %c0_9 = arith.constant 0 : index
    %c0_10 = arith.constant 0 : index
    %25 = vector.load %arg4[%c0_9, %c0_10] : memref<16x32xbf16, #tpu.memory_space<vmem>>, vector<16x32xbf16>
    tpu.vector_store %arg4[%c0_9, %c0_10], %24 {strides = array<i32>} : memref<16x32xbf16, #tpu.memory_space<vmem>>, vector<16x32xbf16>,
    return
  }
  func.func @transform_0(%arg0: i32) -> (i32, i32) {
    %c0_i32 = arith.constant 0 : i32
    %c0_i32_0 = arith.constant 0 : i32
    return %arg0, %c0_i32 : i32, i32
  }
  func.func @transform_1(%arg0: i32) -> (i32, i32) {
    %c0_i32 = arith.constant 0 : i32
    %c0_i32_0 = arith.constant 0 : i32
    %c0_i32_1 = arith.constant 0 : i32
    return %c0_i32, %c0_i32_0 : i32, i32
  }
  func.func @transform_2(%arg0: i32) -> (i32, i32) {
    %c0_i32 = arith.constant 0 : i32
    %c0_i32_0 = arith.constant 0 : i32
    %c0_i32_1 = arith.constant 0 : i32
    return %c0_i32, %c0_i32_0 : i32, i32
  }
  func.func @transform_3(%arg0: i32) -> (i32, i32) {
    %c0_i32 = arith.constant 0 : i32
    %c0_i32_0 = arith.constant 0 : i32
    return %arg0, %c0_i32 : i32, i32
  }
}

module attributes {stable_mosaic.version = 11 : i64} {
  func.func @_dense_kernel(%arg0: i32, %arg1: i32, %arg2: i32, %arg3: memref<16x32xbf16, #tpu.memory_space<vmem>>, %arg4: memref<32x96xbf16, #tpu.memory_space<vmem>>, %arg5: memref<1x96xf32, #tpu.memory_space<vmem>>, %arg6: memref<16x96xbf16, #tpu.memory_space<vmem>>, %arg7: memref<16x96xf32, #tpu.memory_space<vmem>>) attributes {dimension_semantics = [#tpu.dimension_semantics<parallel>, #tpu.dimension_semantics<parallel>, #tpu.dimension_semantics<arbitrary>], iteration_bounds = array<i64: 1, 1, 1>, scalar_prefetch = 0 : i64, scratch_operands = 1 : i64, tpu.core_type = #tpu.core_type<tc>, window_params = [{transform_indices = @transform_0, window_bounds = array<i64: 16, 32>}, {transform_indices = @transform_1, window_bounds = array<i64: 32, 96>}, {transform_indices = @transform_2, window_bounds = array<i64: 1, 96>}, {transform_indices = @transform_3, window_bounds = array<i64: 16, 96>}]} {
    %c0_i32 = arith.constant 0 : i32
    %0 = arith.cmpi eq, %arg2, %c0_i32 : i32
    %1 = arith.extui %0 : i1 to i32
    %c0_i32_0 = arith.constant 0 : i32
    %2 = arith.cmpi ne, %1, %c0_i32_0 : i32
    scf.if %2 {
      %cst_10 = arith.constant 0.000000e+00 : f32
      %12 = vector.broadcast %cst_10 : f32 to vector<16x96xf32>
      %c0_11 = arith.constant 0 : index
      %c0_12 = arith.constant 0 : index
      %13 = vector.load %arg7[%c0_11, %c0_12] : memref<16x96xf32, #tpu.memory_space<vmem>>, vector<16x96xf32>
      tpu.vector_store %arg7[%c0_11, %c0_12], %12 {strides = array<i32>} : memref<16x96xf32, #tpu.memory_space<vmem>>, vector<16x96xf32>,
    } else {
    }
    %c0 = arith.constant 0 : index
    %c0_1 = arith.constant 0 : index
    %3 = vector.load %arg7[%c0, %c0_1] : memref<16x96xf32, #tpu.memory_space<vmem>>, vector<16x96xf32>
    %c0_2 = arith.constant 0 : index
    %c0_3 = arith.constant 0 : index
    %4 = vector.load %arg3[%c0_2, %c0_3] : memref<16x32xbf16, #tpu.memory_space<vmem>>, vector<16x32xbf16>
    %c0_4 = arith.constant 0 : index
    %c0_5 = arith.constant 0 : index
    %5 = vector.load %arg4[%c0_4, %c0_5] : memref<32x96xbf16, #tpu.memory_space<vmem>>, vector<32x96xbf16>
    %cst = arith.constant dense<0.000000e+00> : vector<16x96xf32>
    %6 = tpu.matmul %4, %5, %cst {dimension_numbers = #tpu.dot_dimension_numbers<[1], [0], [0], [1], [0, 0, 1, 1], [], []>} : vector<16x32xbf16>, vector<32x96xbf16>, vector<16x96xf32> -> vector<16x96xf32>
    %7 = arith.addf %3, %6 : vector<16x96xf32>
    %c0_6 = arith.constant 0 : index
    %c0_7 = arith.constant 0 : index
    %8 = vector.load %arg7[%c0_6, %c0_7] : memref<16x96xf32, #tpu.memory_space<vmem>>, vector<16x96xf32>
    tpu.vector_store %arg7[%c0_6, %c0_7], %7 {strides = array<i32>} : memref<16x96xf32, #tpu.memory_space<vmem>>, vector<16x96xf32>,
    %c0_i32_8 = arith.constant 0 : i32
    %9 = arith.cmpi eq, %arg2, %c0_i32_8 : i32
    %10 = arith.extui %9 : i1 to i32
    %c0_i32_9 = arith.constant 0 : i32
    %11 = arith.cmpi ne, %10, %c0_i32_9 : i32
    scf.if %11 {
      %c0_10 = arith.constant 0 : index
      %c0_11 = arith.constant 0 : index
      %12 = vector.load %arg7[%c0_10, %c0_11] : memref<16x96xf32, #tpu.memory_space<vmem>>, vector<16x96xf32>
      %c0_12 = arith.constant 0 : index
      %c0_13 = arith.constant 0 : index
      %13 = vector.load %arg5[%c0_12, %c0_13] : memref<1x96xf32, #tpu.memory_space<vmem>>, vector<1x96xf32>
      %14 = vector.broadcast %13 : vector<1x96xf32> to vector<16x96xf32>
      %15 = arith.addf %12, %14 : vector<16x96xf32>
      %16 = arith.truncf %15 : vector<16x96xf32> to vector<16x96xbf16>
      %c0_14 = arith.constant 0 : index
      %c0_15 = arith.constant 0 : index
      %17 = vector.load %arg6[%c0_14, %c0_15] : memref<16x96xbf16, #tpu.memory_space<vmem>>, vector<16x96xbf16>
      tpu.vector_store %arg6[%c0_14, %c0_15], %16 {strides = array<i32>} : memref<16x96xbf16, #tpu.memory_space<vmem>>, vector<16x96xbf16>,
    } else {
    }
    return
  }
  func.func @transform_0(%arg0: i32, %arg1: i32, %arg2: i32) -> (i32, i32) {
    %c0_i32 = arith.constant 0 : i32
    return %arg0, %arg2 : i32, i32
  }
  func.func @transform_1(%arg0: i32, %arg1: i32, %arg2: i32) -> (i32, i32) {
    %c0_i32 = arith.constant 0 : i32
    return %arg2, %arg1 : i32, i32
  }
  func.func @transform_2(%arg0: i32, %arg1: i32, %arg2: i32) -> (i32, i32) {
    %c0_i32 = arith.constant 0 : i32
    %c0_i32_0 = arith.constant 0 : i32
    return %c0_i32, %arg1 : i32, i32
  }
  func.func @transform_3(%arg0: i32, %arg1: i32, %arg2: i32) -> (i32, i32) {
    %c0_i32 = arith.constant 0 : i32
    return %arg0, %arg1 : i32, i32
  }
}

module attributes {stable_mosaic.version = 11 : i64} {
  func.func @_dense_res_ln_kernel(%arg0: i32, %arg1: i32, %arg2: memref<16x32xbf16, #tpu.memory_space<vmem>>, %arg3: memref<32x32xbf16, #tpu.memory_space<vmem>>, %arg4: memref<1x32xf32, #tpu.memory_space<vmem>>, %arg5: memref<16x32xbf16, #tpu.memory_space<vmem>>, %arg6: memref<1x32xf32, #tpu.memory_space<vmem>>, %arg7: memref<1x32xf32, #tpu.memory_space<vmem>>, %arg8: memref<16x32xbf16, #tpu.memory_space<vmem>>, %arg9: memref<16x32xf32, #tpu.memory_space<vmem>>) attributes {dimension_semantics = [#tpu.dimension_semantics<parallel>, #tpu.dimension_semantics<arbitrary>], iteration_bounds = array<i64: 1, 1>, scalar_prefetch = 0 : i64, scratch_operands = 1 : i64, tpu.core_type = #tpu.core_type<tc>, window_params = [{transform_indices = @transform_0, window_bounds = array<i64: 16, 32>}, {transform_indices = @transform_1, window_bounds = array<i64: 32, 32>}, {pipeline_mode = #tpu.pipeline_mode<synchronous>, transform_indices = @transform_2, window_bounds = array<i64: 1, 32>}, {transform_indices = @transform_3, window_bounds = array<i64: 16, 32>}, {pipeline_mode = #tpu.pipeline_mode<synchronous>, transform_indices = @transform_4, window_bounds = array<i64: 1, 32>}, {pipeline_mode = #tpu.pipeline_mode<synchronous>, transform_indices = @transform_5, window_bounds = array<i64: 1, 32>}, {transform_indices = @transform_6, window_bounds = array<i64: 16, 32>}]} {
    %c0_i32 = arith.constant 0 : i32
    %0 = arith.cmpi eq, %arg1, %c0_i32 : i32
    %1 = arith.extui %0 : i1 to i32
    %c0_i32_0 = arith.constant 0 : i32
    %2 = arith.cmpi ne, %1, %c0_i32_0 : i32
    scf.if %2 {
      %cst_10 = arith.constant 0.000000e+00 : f32
      %12 = vector.broadcast %cst_10 : f32 to vector<16x32xf32>
      %c0_11 = arith.constant 0 : index
      %c0_12 = arith.constant 0 : index
      %13 = vector.load %arg9[%c0_11, %c0_12] : memref<16x32xf32, #tpu.memory_space<vmem>>, vector<16x32xf32>
      tpu.vector_store %arg9[%c0_11, %c0_12], %12 {strides = array<i32>} : memref<16x32xf32, #tpu.memory_space<vmem>>, vector<16x32xf32>,
    } else {
    }
    %c0 = arith.constant 0 : index
    %c0_1 = arith.constant 0 : index
    %3 = vector.load %arg9[%c0, %c0_1] : memref<16x32xf32, #tpu.memory_space<vmem>>, vector<16x32xf32>
    %c0_2 = arith.constant 0 : index
    %c0_3 = arith.constant 0 : index
    %4 = vector.load %arg2[%c0_2, %c0_3] : memref<16x32xbf16, #tpu.memory_space<vmem>>, vector<16x32xbf16>
    %c0_4 = arith.constant 0 : index
    %c0_5 = arith.constant 0 : index
    %5 = vector.load %arg3[%c0_4, %c0_5] : memref<32x32xbf16, #tpu.memory_space<vmem>>, vector<32x32xbf16>
    %cst = arith.constant dense<0.000000e+00> : vector<16x32xf32>
    %6 = tpu.matmul %4, %5, %cst {dimension_numbers = #tpu.dot_dimension_numbers<[1], [0], [0], [1], [0, 0, 1, 1], [], []>} : vector<16x32xbf16>, vector<32x32xbf16>, vector<16x32xf32> -> vector<16x32xf32>
    %7 = arith.addf %3, %6 : vector<16x32xf32>
    %c0_6 = arith.constant 0 : index
    %c0_7 = arith.constant 0 : index
    %8 = vector.load %arg9[%c0_6, %c0_7] : memref<16x32xf32, #tpu.memory_space<vmem>>, vector<16x32xf32>
    tpu.vector_store %arg9[%c0_6, %c0_7], %7 {strides = array<i32>} : memref<16x32xf32, #tpu.memory_space<vmem>>, vector<16x32xf32>,
    %c0_i32_8 = arith.constant 0 : i32
    %9 = arith.cmpi eq, %arg1, %c0_i32_8 : i32
    %10 = arith.extui %9 : i1 to i32
    %c0_i32_9 = arith.constant 0 : i32
    %11 = arith.cmpi ne, %10, %c0_i32_9 : i32
    scf.if %11 {
      %c0_10 = arith.constant 0 : index
      %c0_11 = arith.constant 0 : index
      %12 = vector.load %arg9[%c0_10, %c0_11] : memref<16x32xf32, #tpu.memory_space<vmem>>, vector<16x32xf32>
      %c0_12 = arith.constant 0 : index
      %c0_13 = arith.constant 0 : index
      %13 = vector.load %arg4[%c0_12, %c0_13] : memref<1x32xf32, #tpu.memory_space<vmem>>, vector<1x32xf32>
      %14 = vector.broadcast %13 : vector<1x32xf32> to vector<16x32xf32>
      %15 = arith.addf %12, %14 : vector<16x32xf32>
      %c0_14 = arith.constant 0 : index
      %c0_15 = arith.constant 0 : index
      %16 = vector.load %arg5[%c0_14, %c0_15] : memref<16x32xbf16, #tpu.memory_space<vmem>>, vector<16x32xbf16>
      %17 = arith.extf %16 : vector<16x32xbf16> to vector<16x32xf32>
      %18 = arith.addf %15, %17 : vector<16x32xf32>
      %cst_16 = arith.constant dense<0.000000e+00> : vector<16xf32>
      %19 = vector.multi_reduction <add>, %18, %cst_16 [1] : vector<16x32xf32> to vector<16xf32>
      %20 = vector.shape_cast %19 : vector<16xf32> to vector<16x1xf32>
      %cst_17 = arith.constant 3.200000e+01 : f32
      %21 = vector.broadcast %cst_17 : f32 to vector<16x1xf32>
      %22 = arith.divf %20, %21 : vector<16x1xf32>
      %23 = vector.broadcast %22 : vector<16x1xf32> to vector<16x32xf32>
      %24 = arith.subf %18, %23 : vector<16x32xf32>
      %25 = arith.mulf %24, %24 : vector<16x32xf32>
      %cst_18 = arith.constant dense<0.000000e+00> : vector<16xf32>
      %26 = vector.multi_reduction <add>, %25, %cst_18 [1] : vector<16x32xf32> to vector<16xf32>
      %27 = vector.shape_cast %26 : vector<16xf32> to vector<16x1xf32>
      %cst_19 = arith.constant 3.200000e+01 : f32
      %28 = vector.broadcast %cst_19 : f32 to vector<16x1xf32>
      %29 = arith.divf %27, %28 : vector<16x1xf32>
      %cst_20 = arith.constant 9.99999996E-13 : f32
      %30 = vector.broadcast %cst_20 : f32 to vector<16x1xf32>
      %31 = arith.addf %29, %30 : vector<16x1xf32>
      %32 = math.rsqrt %31 : vector<16x1xf32>
      %33 = vector.broadcast %32 : vector<16x1xf32> to vector<16x32xf32>
      %34 = arith.mulf %24, %33 : vector<16x32xf32>
      %c0_21 = arith.constant 0 : index
      %c0_22 = arith.constant 0 : index
      %35 = vector.load %arg6[%c0_21, %c0_22] : memref<1x32xf32, #tpu.memory_space<vmem>>, vector<1x32xf32>
      %36 = vector.broadcast %35 : vector<1x32xf32> to vector<16x32xf32>
      %37 = arith.mulf %34, %36 : vector<16x32xf32>
      %c0_23 = arith.constant 0 : index
      %c0_24 = arith.constant 0 : index
      %38 = vector.load %arg7[%c0_23, %c0_24] : memref<1x32xf32, #tpu.memory_space<vmem>>, vector<1x32xf32>
      %39 = vector.broadcast %38 : vector<1x32xf32> to vector<16x32xf32>
      %40 = arith.addf %37, %39 : vector<16x32xf32>
      %41 = arith.truncf %40 : vector<16x32xf32> to vector<16x32xbf16>
      %c0_25 = arith.constant 0 : index
      %c0_26 = arith.constant 0 : index
      %42 = vector.load %arg8[%c0_25, %c0_26] : memref<16x32xbf16, #tpu.memory_space<vmem>>, vector<16x32xbf16>
      tpu.vector_store %arg8[%c0_25, %c0_26], %41 {strides = array<i32>} : memref<16x32xbf16, #tpu.memory_space<vmem>>, vector<16x32xbf16>,
    } else {
    }
    return
  }
  func.func @transform_0(%arg0: i32, %arg1: i32) -> (i32, i32) {
    %c0_i32 = arith.constant 0 : i32
    return %arg0, %arg1 : i32, i32
  }
  func.func @transform_1(%arg0: i32, %arg1: i32) -> (i32, i32) {
    %c0_i32 = arith.constant 0 : i32
    %c0_i32_0 = arith.constant 0 : i32
    return %arg1, %c0_i32 : i32, i32
  }
  func.func @transform_2(%arg0: i32, %arg1: i32) -> (i32, i32) {
    %c0_i32 = arith.constant 0 : i32
    %c0_i32_0 = arith.constant 0 : i32
    %c0_i32_1 = arith.constant 0 : i32
    return %c0_i32, %c0_i32_0 : i32, i32
  }
  func.func @transform_3(%arg0: i32, %arg1: i32) -> (i32, i32) {
    %c0_i32 = arith.constant 0 : i32
    %c0_i32_0 = arith.constant 0 : i32
    return %arg0, %c0_i32 : i32, i32
  }
  func.func @transform_4(%arg0: i32, %arg1: i32) -> (i32, i32) {
    %c0_i32 = arith.constant 0 : i32
    %c0_i32_0 = arith.constant 0 : i32
    %c0_i32_1 = arith.constant 0 : i32
    return %c0_i32, %c0_i32_0 : i32, i32
  }
  func.func @transform_5(%arg0: i32, %arg1: i32) -> (i32, i32) {
    %c0_i32 = arith.constant 0 : i32
    %c0_i32_0 = arith.constant 0 : i32
    %c0_i32_1 = arith.constant 0 : i32
    return %c0_i32, %c0_i32_0 : i32, i32
  }
  func.func @transform_6(%arg0: i32, %arg1: i32) -> (i32, i32) {
    %c0_i32 = arith.constant 0 : i32
    %c0_i32_0 = arith.constant 0 : i32
    return %arg0, %c0_i32 : i32, i32
  }
}

module attributes {stable_mosaic.version = 11 : i64} {
  func.func @_attention_kernel(%arg0: i32, %arg1: memref<1x8x96xbf16, #tpu.memory_space<vmem>>, %arg2: memref<1x1x8xf32, #tpu.memory_space<vmem>>, %arg3: memref<1x8x32xbf16, #tpu.memory_space<vmem>>) attributes {dimension_semantics = [#tpu.dimension_semantics<parallel>], iteration_bounds = array<i64: 2>, scalar_prefetch = 0 : i64, scratch_operands = 0 : i64, tpu.core_type = #tpu.core_type<tc>, window_params = [{transform_indices = @transform_0, window_bounds = array<i64: 1, 8, 96>}, {transform_indices = @transform_1, window_bounds = array<i64: 1, 1, 8>}, {transform_indices = @transform_2, window_bounds = array<i64: 1, 8, 32>}]} {
    %c0 = arith.constant 0 : index
    %c0_0 = arith.constant 0 : index
    %c0_1 = arith.constant 0 : index
    %0 = vector.load %arg2[%c0, %c0_0, %c0_1] : memref<1x1x8xf32, #tpu.memory_space<vmem>>, vector<1x1x8xf32>
    %1 = vector.shape_cast %0 : vector<1x1x8xf32> to vector<1x8xf32>
    %c0_2 = arith.constant 0 : index
    %c0_3 = arith.constant 0 : index
    %c0_4 = arith.constant 0 : index
    %2 = vector.load %arg1[%c0_2, %c0_3, %c0_4] : memref<1x8x96xbf16, #tpu.memory_space<vmem>>, vector<1x8x8xbf16>
    %3 = vector.shape_cast %2 : vector<1x8x8xbf16> to vector<8x8xbf16>
    %c0_5 = arith.constant 0 : index
    %c0_6 = arith.constant 0 : index
    %c32 = arith.constant 32 : index
    %4 = vector.load %arg1[%c0_5, %c0_6, %c32] : memref<1x8x96xbf16, #tpu.memory_space<vmem>>, vector<1x8x8xbf16>
    %5 = vector.shape_cast %4 : vector<1x8x8xbf16> to vector<8x8xbf16>
    %c0_7 = arith.constant 0 : index
    %c0_8 = arith.constant 0 : index
    %c64 = arith.constant 64 : index
    %6 = vector.load %arg1[%c0_7, %c0_8, %c64] : memref<1x8x96xbf16, #tpu.memory_space<vmem>>, vector<1x8x8xbf16>
    %7 = vector.shape_cast %6 : vector<1x8x8xbf16> to vector<8x8xbf16>
    %8 = tpu.transpose %5, [1, 0] : vector<8x8xbf16> -> vector<8x8xbf16>
    %cst = arith.constant dense<0.000000e+00> : vector<8x8xf32>
    %9 = tpu.matmul %3, %8, %cst {dimension_numbers = #tpu.dot_dimension_numbers<[1], [0], [0], [1], [0, 0, 1, 1], [], []>} : vector<8x8xbf16>, vector<8x8xbf16>, vector<8x8xf32> -> vector<8x8xf32>
    %cst_9 = arith.constant 0.353553385 : f32
    %10 = vector.broadcast %cst_9 : f32 to vector<8x8xf32>
    %11 = arith.mulf %9, %10 : vector<8x8xf32>
    %12 = vector.broadcast %1 : vector<1x8xf32> to vector<8x8xf32>
    %13 = arith.addf %11, %12 : vector<8x8xf32>
    %cst_10 = arith.constant dense<0xFF800000> : vector<8xf32>
    %14 = vector.multi_reduction <maximumf>, %13, %cst_10 [1] : vector<8x8xf32> to vector<8xf32>
    %15 = vector.shape_cast %14 : vector<8xf32> to vector<8x1xf32>
    %16 = vector.broadcast %15 : vector<8x1xf32> to vector<8x8xf32>
    %17 = arith.subf %13, %16 : vector<8x8xf32>
    %18 = math.exp %17 : vector<8x8xf32>
    %cst_11 = arith.constant dense<0.000000e+00> : vector<8xf32>
    %19 = vector.multi_reduction <add>, %18, %cst_11 [1] : vector<8x8xf32> to vector<8xf32>
    %20 = vector.shape_cast %19 : vector<8xf32> to vector<8x1xf32>
    %21 = tpu.reciprocal %20 {approx = true} : vector<8x1xf32> -> vector<8x1xf32>
    %22 = vector.broadcast %21 : vector<8x1xf32> to vector<8x8xf32>
    %23 = arith.mulf %18, %22 : vector<8x8xf32>
    %24 = arith.truncf %23 : vector<8x8xf32> to vector<8x8xbf16>
    %cst_12 = arith.constant dense<0.000000e+00> : vector<8x8xf32>
    %25 = tpu.matmul %24, %7, %cst_12 {dimension_numbers = #tpu.dot_dimension_numbers<[1], [0], [0], [1], [0, 0, 1, 1], [], []>} : vector<8x8xbf16>, vector<8x8xbf16>, vector<8x8xf32> -> vector<8x8xf32>
    %c0_13 = arith.constant 0 : index
    %c0_14 = arith.constant 0 : index
    %c8 = arith.constant 8 : index
    %26 = vector.load %arg1[%c0_13, %c0_14, %c8] : memref<1x8x96xbf16, #tpu.memory_space<vmem>>, vector<1x8x8xbf16>
    %27 = vector.shape_cast %26 : vector<1x8x8xbf16> to vector<8x8xbf16>
    %c0_15 = arith.constant 0 : index
    %c0_16 = arith.constant 0 : index
    %c40 = arith.constant 40 : index
    %28 = vector.load %arg1[%c0_15, %c0_16, %c40] : memref<1x8x96xbf16, #tpu.memory_space<vmem>>, vector<1x8x8xbf16>
    %29 = vector.shape_cast %28 : vector<1x8x8xbf16> to vector<8x8xbf16>
    %c0_17 = arith.constant 0 : index
    %c0_18 = arith.constant 0 : index
    %c72 = arith.constant 72 : index
    %30 = vector.load %arg1[%c0_17, %c0_18, %c72] : memref<1x8x96xbf16, #tpu.memory_space<vmem>>, vector<1x8x8xbf16>
    %31 = vector.shape_cast %30 : vector<1x8x8xbf16> to vector<8x8xbf16>
    %32 = tpu.transpose %29, [1, 0] : vector<8x8xbf16> -> vector<8x8xbf16>
    %cst_19 = arith.constant dense<0.000000e+00> : vector<8x8xf32>
    %33 = tpu.matmul %27, %32, %cst_19 {dimension_numbers = #tpu.dot_dimension_numbers<[1], [0], [0], [1], [0, 0, 1, 1], [], []>} : vector<8x8xbf16>, vector<8x8xbf16>, vector<8x8xf32> -> vector<8x8xf32>
    %cst_20 = arith.constant 0.353553385 : f32
    %34 = vector.broadcast %cst_20 : f32 to vector<8x8xf32>
    %35 = arith.mulf %33, %34 : vector<8x8xf32>
    %36 = vector.broadcast %1 : vector<1x8xf32> to vector<8x8xf32>
    %37 = arith.addf %35, %36 : vector<8x8xf32>
    %cst_21 = arith.constant dense<0xFF800000> : vector<8xf32>
    %38 = vector.multi_reduction <maximumf>, %37, %cst_21 [1] : vector<8x8xf32> to vector<8xf32>
    %39 = vector.shape_cast %38 : vector<8xf32> to vector<8x1xf32>
    %40 = vector.broadcast %39 : vector<8x1xf32> to vector<8x8xf32>
    %41 = arith.subf %37, %40 : vector<8x8xf32>
    %42 = math.exp %41 : vector<8x8xf32>
    %cst_22 = arith.constant dense<0.000000e+00> : vector<8xf32>
    %43 = vector.multi_reduction <add>, %42, %cst_22 [1] : vector<8x8xf32> to vector<8xf32>
    %44 = vector.shape_cast %43 : vector<8xf32> to vector<8x1xf32>
    %45 = tpu.reciprocal %44 {approx = true} : vector<8x1xf32> -> vector<8x1xf32>
    %46 = vector.broadcast %45 : vector<8x1xf32> to vector<8x8xf32>
    %47 = arith.mulf %42, %46 : vector<8x8xf32>
    %48 = arith.truncf %47 : vector<8x8xf32> to vector<8x8xbf16>
    %cst_23 = arith.constant dense<0.000000e+00> : vector<8x8xf32>
    %49 = tpu.matmul %48, %31, %cst_23 {dimension_numbers = #tpu.dot_dimension_numbers<[1], [0], [0], [1], [0, 0, 1, 1], [], []>} : vector<8x8xbf16>, vector<8x8xbf16>, vector<8x8xf32> -> vector<8x8xf32>
    %c0_24 = arith.constant 0 : index
    %c0_25 = arith.constant 0 : index
    %c16 = arith.constant 16 : index
    %50 = vector.load %arg1[%c0_24, %c0_25, %c16] : memref<1x8x96xbf16, #tpu.memory_space<vmem>>, vector<1x8x8xbf16>
    %51 = vector.shape_cast %50 : vector<1x8x8xbf16> to vector<8x8xbf16>
    %c0_26 = arith.constant 0 : index
    %c0_27 = arith.constant 0 : index
    %c48 = arith.constant 48 : index
    %52 = vector.load %arg1[%c0_26, %c0_27, %c48] : memref<1x8x96xbf16, #tpu.memory_space<vmem>>, vector<1x8x8xbf16>
    %53 = vector.shape_cast %52 : vector<1x8x8xbf16> to vector<8x8xbf16>
    %c0_28 = arith.constant 0 : index
    %c0_29 = arith.constant 0 : index
    %c80 = arith.constant 80 : index
    %54 = vector.load %arg1[%c0_28, %c0_29, %c80] : memref<1x8x96xbf16, #tpu.memory_space<vmem>>, vector<1x8x8xbf16>
    %55 = vector.shape_cast %54 : vector<1x8x8xbf16> to vector<8x8xbf16>
    %56 = tpu.transpose %53, [1, 0] : vector<8x8xbf16> -> vector<8x8xbf16>
    %cst_30 = arith.constant dense<0.000000e+00> : vector<8x8xf32>
    %57 = tpu.matmul %51, %56, %cst_30 {dimension_numbers = #tpu.dot_dimension_numbers<[1], [0], [0], [1], [0, 0, 1, 1], [], []>} : vector<8x8xbf16>, vector<8x8xbf16>, vector<8x8xf32> -> vector<8x8xf32>
    %cst_31 = arith.constant 0.353553385 : f32
    %58 = vector.broadcast %cst_31 : f32 to vector<8x8xf32>
    %59 = arith.mulf %57, %58 : vector<8x8xf32>
    %60 = vector.broadcast %1 : vector<1x8xf32> to vector<8x8xf32>
    %61 = arith.addf %59, %60 : vector<8x8xf32>
    %cst_32 = arith.constant dense<0xFF800000> : vector<8xf32>
    %62 = vector.multi_reduction <maximumf>, %61, %cst_32 [1] : vector<8x8xf32> to vector<8xf32>
    %63 = vector.shape_cast %62 : vector<8xf32> to vector<8x1xf32>
    %64 = vector.broadcast %63 : vector<8x1xf32> to vector<8x8xf32>
    %65 = arith.subf %61, %64 : vector<8x8xf32>
    %66 = math.exp %65 : vector<8x8xf32>
    %cst_33 = arith.constant dense<0.000000e+00> : vector<8xf32>
    %67 = vector.multi_reduction <add>, %66, %cst_33 [1] : vector<8x8xf32> to vector<8xf32>
    %68 = vector.shape_cast %67 : vector<8xf32> to vector<8x1xf32>
    %69 = tpu.reciprocal %68 {approx = true} : vector<8x1xf32> -> vector<8x1xf32>
    %70 = vector.broadcast %69 : vector<8x1xf32> to vector<8x8xf32>
    %71 = arith.mulf %66, %70 : vector<8x8xf32>
    %72 = arith.truncf %71 : vector<8x8xf32> to vector<8x8xbf16>
    %cst_34 = arith.constant dense<0.000000e+00> : vector<8x8xf32>
    %73 = tpu.matmul %72, %55, %cst_34 {dimension_numbers = #tpu.dot_dimension_numbers<[1], [0], [0], [1], [0, 0, 1, 1], [], []>} : vector<8x8xbf16>, vector<8x8xbf16>, vector<8x8xf32> -> vector<8x8xf32>
    %c0_35 = arith.constant 0 : index
    %c0_36 = arith.constant 0 : index
    %c24 = arith.constant 24 : index
    %74 = vector.load %arg1[%c0_35, %c0_36, %c24] : memref<1x8x96xbf16, #tpu.memory_space<vmem>>, vector<1x8x8xbf16>
    %75 = vector.shape_cast %74 : vector<1x8x8xbf16> to vector<8x8xbf16>
    %c0_37 = arith.constant 0 : index
    %c0_38 = arith.constant 0 : index
    %c56 = arith.constant 56 : index
    %76 = vector.load %arg1[%c0_37, %c0_38, %c56] : memref<1x8x96xbf16, #tpu.memory_space<vmem>>, vector<1x8x8xbf16>
    %77 = vector.shape_cast %76 : vector<1x8x8xbf16> to vector<8x8xbf16>
    %c0_39 = arith.constant 0 : index
    %c0_40 = arith.constant 0 : index
    %c88 = arith.constant 88 : index
    %78 = vector.load %arg1[%c0_39, %c0_40, %c88] : memref<1x8x96xbf16, #tpu.memory_space<vmem>>, vector<1x8x8xbf16>
    %79 = vector.shape_cast %78 : vector<1x8x8xbf16> to vector<8x8xbf16>
    %80 = tpu.transpose %77, [1, 0] : vector<8x8xbf16> -> vector<8x8xbf16>
    %cst_41 = arith.constant dense<0.000000e+00> : vector<8x8xf32>
    %81 = tpu.matmul %75, %80, %cst_41 {dimension_numbers = #tpu.dot_dimension_numbers<[1], [0], [0], [1], [0, 0, 1, 1], [], []>} : vector<8x8xbf16>, vector<8x8xbf16>, vector<8x8xf32> -> vector<8x8xf32>
    %cst_42 = arith.constant 0.353553385 : f32
    %82 = vector.broadcast %cst_42 : f32 to vector<8x8xf32>
    %83 = arith.mulf %81, %82 : vector<8x8xf32>
    %84 = vector.broadcast %1 : vector<1x8xf32> to vector<8x8xf32>
    %85 = arith.addf %83, %84 : vector<8x8xf32>
    %cst_43 = arith.constant dense<0xFF800000> : vector<8xf32>
    %86 = vector.multi_reduction <maximumf>, %85, %cst_43 [1] : vector<8x8xf32> to vector<8xf32>
    %87 = vector.shape_cast %86 : vector<8xf32> to vector<8x1xf32>
    %88 = vector.broadcast %87 : vector<8x1xf32> to vector<8x8xf32>
    %89 = arith.subf %85, %88 : vector<8x8xf32>
    %90 = math.exp %89 : vector<8x8xf32>
    %cst_44 = arith.constant dense<0.000000e+00> : vector<8xf32>
    %91 = vector.multi_reduction <add>, %90, %cst_44 [1] : vector<8x8xf32> to vector<8xf32>
    %92 = vector.shape_cast %91 : vector<8xf32> to vector<8x1xf32>
    %93 = tpu.reciprocal %92 {approx = true} : vector<8x1xf32> -> vector<8x1xf32>
    %94 = vector.broadcast %93 : vector<8x1xf32> to vector<8x8xf32>
    %95 = arith.mulf %90, %94 : vector<8x8xf32>
    %96 = arith.truncf %95 : vector<8x8xf32> to vector<8x8xbf16>
    %cst_45 = arith.constant dense<0.000000e+00> : vector<8x8xf32>
    %97 = tpu.matmul %96, %79, %cst_45 {dimension_numbers = #tpu.dot_dimension_numbers<[1], [0], [0], [1], [0, 0, 1, 1], [], []>} : vector<8x8xbf16>, vector<8x8xbf16>, vector<8x8xf32> -> vector<8x8xf32>
    %98 = tpu.concatenate %25, %49, %73, %97 in 1 : vector<8x8xf32>, vector<8x8xf32>, vector<8x8xf32>, vector<8x8xf32> -> vector<8x32xf32>
    %99 = vector.shape_cast %98 : vector<8x32xf32> to vector<1x8x32xf32>
    %100 = arith.truncf %99 : vector<1x8x32xf32> to vector<1x8x32xbf16>
    %c0_46 = arith.constant 0 : index
    %c0_47 = arith.constant 0 : index
    %c0_48 = arith.constant 0 : index
    %101 = vector.load %arg3[%c0_46, %c0_47, %c0_48] : memref<1x8x32xbf16, #tpu.memory_space<vmem>>, vector<1x8x32xbf16>
    tpu.vector_store %arg3[%c0_46, %c0_47, %c0_48], %100 {strides = array<i32>} : memref<1x8x32xbf16, #tpu.memory_space<vmem>>, vector<1x8x32xbf16>,
    return
  }
  func.func @transform_0(%arg0: i32) -> (i32, i32, i32) {
    %c0_i32 = arith.constant 0 : i32
    %c0_i32_0 = arith.constant 0 : i32
    %c0_i32_1 = arith.constant 0 : i32
    return %arg0, %c0_i32, %c0_i32_0 : i32, i32, i32
  }
  func.func @transform_1(%arg0: i32) -> (i32, i32, i32) {
    %c0_i32 = arith.constant 0 : i32
    %c0_i32_0 = arith.constant 0 : i32
    %c0_i32_1 = arith.constant 0 : i32
    return %arg0, %c0_i32, %c0_i32_0 : i32, i32, i32
  }
  func.func @transform_2(%arg0: i32) -> (i32, i32, i32) {
    %c0_i32 = arith.constant 0 : i32
    %c0_i32_0 = arith.constant 0 : i32
    %c0_i32_1 = arith.constant 0 : i32
    return %arg0, %c0_i32, %c0_i32_0 : i32, i32, i32
  }
}

module attributes {stable_mosaic.version = 11 : i64} {
  func.func @_dense_kernel(%arg0: i32, %arg1: i32, %arg2: i32, %arg3: memref<16x32xbf16, #tpu.memory_space<vmem>>, %arg4: memref<32x64xbf16, #tpu.memory_space<vmem>>, %arg5: memref<1x64xf32, #tpu.memory_space<vmem>>, %arg6: memref<16x64xbf16, #tpu.memory_space<vmem>>, %arg7: memref<16x64xf32, #tpu.memory_space<vmem>>) attributes {dimension_semantics = [#tpu.dimension_semantics<parallel>, #tpu.dimension_semantics<parallel>, #tpu.dimension_semantics<arbitrary>], iteration_bounds = array<i64: 1, 1, 1>, scalar_prefetch = 0 : i64, scratch_operands = 1 : i64, tpu.core_type = #tpu.core_type<tc>, window_params = [{transform_indices = @transform_0, window_bounds = array<i64: 16, 32>}, {transform_indices = @transform_1, window_bounds = array<i64: 32, 64>}, {transform_indices = @transform_2, window_bounds = array<i64: 1, 64>}, {transform_indices = @transform_3, window_bounds = array<i64: 16, 64>}]} {
    %c0_i32 = arith.constant 0 : i32
    %0 = arith.cmpi eq, %arg2, %c0_i32 : i32
    %1 = arith.extui %0 : i1 to i32
    %c0_i32_0 = arith.constant 0 : i32
    %2 = arith.cmpi ne, %1, %c0_i32_0 : i32
    scf.if %2 {
      %cst_10 = arith.constant 0.000000e+00 : f32
      %12 = vector.broadcast %cst_10 : f32 to vector<16x64xf32>
      %c0_11 = arith.constant 0 : index
      %c0_12 = arith.constant 0 : index
      %13 = vector.load %arg7[%c0_11, %c0_12] : memref<16x64xf32, #tpu.memory_space<vmem>>, vector<16x64xf32>
      tpu.vector_store %arg7[%c0_11, %c0_12], %12 {strides = array<i32>} : memref<16x64xf32, #tpu.memory_space<vmem>>, vector<16x64xf32>,
    } else {
    }
    %c0 = arith.constant 0 : index
    %c0_1 = arith.constant 0 : index
    %3 = vector.load %arg7[%c0, %c0_1] : memref<16x64xf32, #tpu.memory_space<vmem>>, vector<16x64xf32>
    %c0_2 = arith.constant 0 : index
    %c0_3 = arith.constant 0 : index
    %4 = vector.load %arg3[%c0_2, %c0_3] : memref<16x32xbf16, #tpu.memory_space<vmem>>, vector<16x32xbf16>
    %c0_4 = arith.constant 0 : index
    %c0_5 = arith.constant 0 : index
    %5 = vector.load %arg4[%c0_4, %c0_5] : memref<32x64xbf16, #tpu.memory_space<vmem>>, vector<32x64xbf16>
    %cst = arith.constant dense<0.000000e+00> : vector<16x64xf32>
    %6 = tpu.matmul %4, %5, %cst {dimension_numbers = #tpu.dot_dimension_numbers<[1], [0], [0], [1], [0, 0, 1, 1], [], []>} : vector<16x32xbf16>, vector<32x64xbf16>, vector<16x64xf32> -> vector<16x64xf32>
    %7 = arith.addf %3, %6 : vector<16x64xf32>
    %c0_6 = arith.constant 0 : index
    %c0_7 = arith.constant 0 : index
    %8 = vector.load %arg7[%c0_6, %c0_7] : memref<16x64xf32, #tpu.memory_space<vmem>>, vector<16x64xf32>
    tpu.vector_store %arg7[%c0_6, %c0_7], %7 {strides = array<i32>} : memref<16x64xf32, #tpu.memory_space<vmem>>, vector<16x64xf32>,
    %c0_i32_8 = arith.constant 0 : i32
    %9 = arith.cmpi eq, %arg2, %c0_i32_8 : i32
    %10 = arith.extui %9 : i1 to i32
    %c0_i32_9 = arith.constant 0 : i32
    %11 = arith.cmpi ne, %10, %c0_i32_9 : i32
    scf.if %11 {
      %c0_10 = arith.constant 0 : index
      %c0_11 = arith.constant 0 : index
      %12 = vector.load %arg7[%c0_10, %c0_11] : memref<16x64xf32, #tpu.memory_space<vmem>>, vector<16x64xf32>
      %c0_12 = arith.constant 0 : index
      %c0_13 = arith.constant 0 : index
      %13 = vector.load %arg5[%c0_12, %c0_13] : memref<1x64xf32, #tpu.memory_space<vmem>>, vector<1x64xf32>
      %14 = vector.broadcast %13 : vector<1x64xf32> to vector<16x64xf32>
      %15 = arith.addf %12, %14 : vector<16x64xf32>
      %cst_14 = arith.constant 5.000000e-01 : f32
      %16 = vector.broadcast %cst_14 : f32 to vector<16x64xf32>
      %17 = arith.mulf %16, %15 : vector<16x64xf32>
      %cst_15 = arith.constant 4.471500e-02 : f32
      %18 = vector.broadcast %cst_15 : f32 to vector<16x64xf32>
      %19 = arith.mulf %18, %15 : vector<16x64xf32>
      %20 = arith.mulf %19, %15 : vector<16x64xf32>
      %21 = arith.mulf %20, %15 : vector<16x64xf32>
      %22 = arith.addf %15, %21 : vector<16x64xf32>
      %cst_16 = arith.constant 0.797884583 : f32
      %23 = vector.broadcast %cst_16 : f32 to vector<16x64xf32>
      %24 = arith.mulf %23, %22 : vector<16x64xf32>
      %25 = math.tanh %24 : vector<16x64xf32>
      %cst_17 = arith.constant 1.000000e+00 : f32
      %26 = vector.broadcast %cst_17 : f32 to vector<16x64xf32>
      %27 = arith.addf %26, %25 : vector<16x64xf32>
      %28 = arith.mulf %17, %27 : vector<16x64xf32>
      %29 = arith.truncf %28 : vector<16x64xf32> to vector<16x64xbf16>
      %c0_18 = arith.constant 0 : index
      %c0_19 = arith.constant 0 : index
      %30 = vector.load %arg6[%c0_18, %c0_19] : memref<16x64xbf16, #tpu.memory_space<vmem>>, vector<16x64xbf16>
      tpu.vector_store %arg6[%c0_18, %c0_19], %29 {strides = array<i32>} : memref<16x64xbf16, #tpu.memory_space<vmem>>, vector<16x64xbf16>,
    } else {
    }
    return
  }
  func.func @transform_0(%arg0: i32, %arg1: i32, %arg2: i32) -> (i32, i32) {
    %c0_i32 = arith.constant 0 : i32
    return %arg0, %arg2 : i32, i32
  }
  func.func @transform_1(%arg0: i32, %arg1: i32, %arg2: i32) -> (i32, i32) {
    %c0_i32 = arith.constant 0 : i32
    return %arg2, %arg1 : i32, i32
  }
  func.func @transform_2(%arg0: i32, %arg1: i32, %arg2: i32) -> (i32, i32) {
    %c0_i32 = arith.constant 0 : i32
    %c0_i32_0 = arith.constant 0 : i32
    return %c0_i32, %arg1 : i32, i32
  }
  func.func @transform_3(%arg0: i32, %arg1: i32, %arg2: i32) -> (i32, i32) {
    %c0_i32 = arith.constant 0 : i32
    return %arg0, %arg1 : i32, i32
  }
}

module attributes {stable_mosaic.version = 11 : i64} {
  func.func @_dense_res_ln_kernel(%arg0: i32, %arg1: i32, %arg2: memref<16x64xbf16, #tpu.memory_space<vmem>>, %arg3: memref<64x32xbf16, #tpu.memory_space<vmem>>, %arg4: memref<1x32xf32, #tpu.memory_space<vmem>>, %arg5: memref<16x32xbf16, #tpu.memory_space<vmem>>, %arg6: memref<1x32xf32, #tpu.memory_space<vmem>>, %arg7: memref<1x32xf32, #tpu.memory_space<vmem>>, %arg8: memref<16x32xbf16, #tpu.memory_space<vmem>>, %arg9: memref<16x32xf32, #tpu.memory_space<vmem>>) attributes {dimension_semantics = [#tpu.dimension_semantics<parallel>, #tpu.dimension_semantics<arbitrary>], iteration_bounds = array<i64: 1, 1>, scalar_prefetch = 0 : i64, scratch_operands = 1 : i64, tpu.core_type = #tpu.core_type<tc>, window_params = [{transform_indices = @transform_0, window_bounds = array<i64: 16, 64>}, {transform_indices = @transform_1, window_bounds = array<i64: 64, 32>}, {pipeline_mode = #tpu.pipeline_mode<synchronous>, transform_indices = @transform_2, window_bounds = array<i64: 1, 32>}, {transform_indices = @transform_3, window_bounds = array<i64: 16, 32>}, {pipeline_mode = #tpu.pipeline_mode<synchronous>, transform_indices = @transform_4, window_bounds = array<i64: 1, 32>}, {pipeline_mode = #tpu.pipeline_mode<synchronous>, transform_indices = @transform_5, window_bounds = array<i64: 1, 32>}, {transform_indices = @transform_6, window_bounds = array<i64: 16, 32>}]} {
    %c0_i32 = arith.constant 0 : i32
    %0 = arith.cmpi eq, %arg1, %c0_i32 : i32
    %1 = arith.extui %0 : i1 to i32
    %c0_i32_0 = arith.constant 0 : i32
    %2 = arith.cmpi ne, %1, %c0_i32_0 : i32
    scf.if %2 {
      %cst_10 = arith.constant 0.000000e+00 : f32
      %12 = vector.broadcast %cst_10 : f32 to vector<16x32xf32>
      %c0_11 = arith.constant 0 : index
      %c0_12 = arith.constant 0 : index
      %13 = vector.load %arg9[%c0_11, %c0_12] : memref<16x32xf32, #tpu.memory_space<vmem>>, vector<16x32xf32>
      tpu.vector_store %arg9[%c0_11, %c0_12], %12 {strides = array<i32>} : memref<16x32xf32, #tpu.memory_space<vmem>>, vector<16x32xf32>,
    } else {
    }
    %c0 = arith.constant 0 : index
    %c0_1 = arith.constant 0 : index
    %3 = vector.load %arg9[%c0, %c0_1] : memref<16x32xf32, #tpu.memory_space<vmem>>, vector<16x32xf32>
    %c0_2 = arith.constant 0 : index
    %c0_3 = arith.constant 0 : index
    %4 = vector.load %arg2[%c0_2, %c0_3] : memref<16x64xbf16, #tpu.memory_space<vmem>>, vector<16x64xbf16>
    %c0_4 = arith.constant 0 : index
    %c0_5 = arith.constant 0 : index
    %5 = vector.load %arg3[%c0_4, %c0_5] : memref<64x32xbf16, #tpu.memory_space<vmem>>, vector<64x32xbf16>
    %cst = arith.constant dense<0.000000e+00> : vector<16x32xf32>
    %6 = tpu.matmul %4, %5, %cst {dimension_numbers = #tpu.dot_dimension_numbers<[1], [0], [0], [1], [0, 0, 1, 1], [], []>} : vector<16x64xbf16>, vector<64x32xbf16>, vector<16x32xf32> -> vector<16x32xf32>
    %7 = arith.addf %3, %6 : vector<16x32xf32>
    %c0_6 = arith.constant 0 : index
    %c0_7 = arith.constant 0 : index
    %8 = vector.load %arg9[%c0_6, %c0_7] : memref<16x32xf32, #tpu.memory_space<vmem>>, vector<16x32xf32>
    tpu.vector_store %arg9[%c0_6, %c0_7], %7 {strides = array<i32>} : memref<16x32xf32, #tpu.memory_space<vmem>>, vector<16x32xf32>,
    %c0_i32_8 = arith.constant 0 : i32
    %9 = arith.cmpi eq, %arg1, %c0_i32_8 : i32
    %10 = arith.extui %9 : i1 to i32
    %c0_i32_9 = arith.constant 0 : i32
    %11 = arith.cmpi ne, %10, %c0_i32_9 : i32
    scf.if %11 {
      %c0_10 = arith.constant 0 : index
      %c0_11 = arith.constant 0 : index
      %12 = vector.load %arg9[%c0_10, %c0_11] : memref<16x32xf32, #tpu.memory_space<vmem>>, vector<16x32xf32>
      %c0_12 = arith.constant 0 : index
      %c0_13 = arith.constant 0 : index
      %13 = vector.load %arg4[%c0_12, %c0_13] : memref<1x32xf32, #tpu.memory_space<vmem>>, vector<1x32xf32>
      %14 = vector.broadcast %13 : vector<1x32xf32> to vector<16x32xf32>
      %15 = arith.addf %12, %14 : vector<16x32xf32>
      %c0_14 = arith.constant 0 : index
      %c0_15 = arith.constant 0 : index
      %16 = vector.load %arg5[%c0_14, %c0_15] : memref<16x32xbf16, #tpu.memory_space<vmem>>, vector<16x32xbf16>
      %17 = arith.extf %16 : vector<16x32xbf16> to vector<16x32xf32>
      %18 = arith.addf %15, %17 : vector<16x32xf32>
      %cst_16 = arith.constant dense<0.000000e+00> : vector<16xf32>
      %19 = vector.multi_reduction <add>, %18, %cst_16 [1] : vector<16x32xf32> to vector<16xf32>
      %20 = vector.shape_cast %19 : vector<16xf32> to vector<16x1xf32>
      %cst_17 = arith.constant 3.200000e+01 : f32
      %21 = vector.broadcast %cst_17 : f32 to vector<16x1xf32>
      %22 = arith.divf %20, %21 : vector<16x1xf32>
      %23 = vector.broadcast %22 : vector<16x1xf32> to vector<16x32xf32>
      %24 = arith.subf %18, %23 : vector<16x32xf32>
      %25 = arith.mulf %24, %24 : vector<16x32xf32>
      %cst_18 = arith.constant dense<0.000000e+00> : vector<16xf32>
      %26 = vector.multi_reduction <add>, %25, %cst_18 [1] : vector<16x32xf32> to vector<16xf32>
      %27 = vector.shape_cast %26 : vector<16xf32> to vector<16x1xf32>
      %cst_19 = arith.constant 3.200000e+01 : f32
      %28 = vector.broadcast %cst_19 : f32 to vector<16x1xf32>
      %29 = arith.divf %27, %28 : vector<16x1xf32>
      %cst_20 = arith.constant 9.99999996E-13 : f32
      %30 = vector.broadcast %cst_20 : f32 to vector<16x1xf32>
      %31 = arith.addf %29, %30 : vector<16x1xf32>
      %32 = math.rsqrt %31 : vector<16x1xf32>
      %33 = vector.broadcast %32 : vector<16x1xf32> to vector<16x32xf32>
      %34 = arith.mulf %24, %33 : vector<16x32xf32>
      %c0_21 = arith.constant 0 : index
      %c0_22 = arith.constant 0 : index
      %35 = vector.load %arg6[%c0_21, %c0_22] : memref<1x32xf32, #tpu.memory_space<vmem>>, vector<1x32xf32>
      %36 = vector.broadcast %35 : vector<1x32xf32> to vector<16x32xf32>
      %37 = arith.mulf %34, %36 : vector<16x32xf32>
      %c0_23 = arith.constant 0 : index
      %c0_24 = arith.constant 0 : index
      %38 = vector.load %arg7[%c0_23, %c0_24] : memref<1x32xf32, #tpu.memory_space<vmem>>, vector<1x32xf32>
      %39 = vector.broadcast %38 : vector<1x32xf32> to vector<16x32xf32>
      %40 = arith.addf %37, %39 : vector<16x32xf32>
      %41 = arith.truncf %40 : vector<16x32xf32> to vector<16x32xbf16>
      %c0_25 = arith.constant 0 : index
      %c0_26 = arith.constant 0 : index
      %42 = vector.load %arg8[%c0_25, %c0_26] : memref<16x32xbf16, #tpu.memory_space<vmem>>, vector<16x32xbf16>
      tpu.vector_store %arg8[%c0_25, %c0_26], %41 {strides = array<i32>} : memref<16x32xbf16, #tpu.memory_space<vmem>>, vector<16x32xbf16>,
    } else {
    }
    return
  }
  func.func @transform_0(%arg0: i32, %arg1: i32) -> (i32, i32) {
    %c0_i32 = arith.constant 0 : i32
    return %arg0, %arg1 : i32, i32
  }
  func.func @transform_1(%arg0: i32, %arg1: i32) -> (i32, i32) {
    %c0_i32 = arith.constant 0 : i32
    %c0_i32_0 = arith.constant 0 : i32
    return %arg1, %c0_i32 : i32, i32
  }
  func.func @transform_2(%arg0: i32, %arg1: i32) -> (i32, i32) {
    %c0_i32 = arith.constant 0 : i32
    %c0_i32_0 = arith.constant 0 : i32
    %c0_i32_1 = arith.constant 0 : i32
    return %c0_i32, %c0_i32_0 : i32, i32
  }
  func.func @transform_3(%arg0: i32, %arg1: i32) -> (i32, i32) {
    %c0_i32 = arith.constant 0 : i32
    %c0_i32_0 = arith.constant 0 : i32
    return %arg0, %c0_i32 : i32, i32
  }
  func.func @transform_4(%arg0: i32, %arg1: i32) -> (i32, i32) {
    %c0_i32 = arith.constant 0 : i32
    %c0_i32_0 = arith.constant 0 : i32
    %c0_i32_1 = arith.constant 0 : i32
    return %c0_i32, %c0_i32_0 : i32, i32
  }
  func.func @transform_5(%arg0: i32, %arg1: i32) -> (i32, i32) {
    %c0_i32 = arith.constant 0 : i32
    %c0_i32_0 = arith.constant 0 : i32
    %c0_i32_1 = arith.constant 0 : i32
    return %c0_i32, %c0_i32_0 : i32, i32
  }
  func.func @transform_6(%arg0: i32, %arg1: i32) -> (i32, i32) {
    %c0_i32 = arith.constant 0 : i32
    %c0_i32_0 = arith.constant 0 : i32
    return %arg0, %c0_i32 : i32, i32
  }
}

module attributes {stable_mosaic.version = 11 : i64} {
  func.func @_pooler_head_kernel(%arg0: i32, %arg1: memref<2x32xbf16, #tpu.memory_space<vmem>>, %arg2: memref<32x32xbf16, #tpu.memory_space<vmem>>, %arg3: memref<1x32xf32, #tpu.memory_space<vmem>>, %arg4: memref<32x3xbf16, #tpu.memory_space<vmem>>, %arg5: memref<1x3xf32, #tpu.memory_space<vmem>>, %arg6: memref<2x3xf32, #tpu.memory_space<vmem>>) attributes {dimension_semantics = [#tpu.dimension_semantics<arbitrary>], iteration_bounds = array<i64: 1>, scalar_prefetch = 0 : i64, scratch_operands = 0 : i64, tpu.core_type = #tpu.core_type<tc>, window_params = [{pipeline_mode = #tpu.pipeline_mode<synchronous>, transform_indices = @transform_0, window_bounds = array<i64: 2, 32>}, {pipeline_mode = #tpu.pipeline_mode<synchronous>, transform_indices = @transform_1, window_bounds = array<i64: 32, 32>}, {pipeline_mode = #tpu.pipeline_mode<synchronous>, transform_indices = @transform_2, window_bounds = array<i64: 1, 32>}, {pipeline_mode = #tpu.pipeline_mode<synchronous>, transform_indices = @transform_3, window_bounds = array<i64: 32, 3>}, {pipeline_mode = #tpu.pipeline_mode<synchronous>, transform_indices = @transform_4, window_bounds = array<i64: 1, 3>}, {pipeline_mode = #tpu.pipeline_mode<synchronous>, transform_indices = @transform_5, window_bounds = array<i64: 2, 3>}]} {
    %c0 = arith.constant 0 : index
    %c0_0 = arith.constant 0 : index
    %0 = vector.load %arg1[%c0, %c0_0] : memref<2x32xbf16, #tpu.memory_space<vmem>>, vector<2x32xbf16>
    %c0_1 = arith.constant 0 : index
    %c0_2 = arith.constant 0 : index
    %1 = vector.load %arg2[%c0_1, %c0_2] : memref<32x32xbf16, #tpu.memory_space<vmem>>, vector<32x32xbf16>
    %cst = arith.constant dense<0.000000e+00> : vector<2x32xf32>
    %2 = tpu.matmul %0, %1, %cst {dimension_numbers = #tpu.dot_dimension_numbers<[1], [0], [0], [1], [0, 0, 1, 1], [], []>} : vector<2x32xbf16>, vector<32x32xbf16>, vector<2x32xf32> -> vector<2x32xf32>
    %c0_3 = arith.constant 0 : index
    %c0_4 = arith.constant 0 : index
    %3 = vector.load %arg3[%c0_3, %c0_4] : memref<1x32xf32, #tpu.memory_space<vmem>>, vector<1x32xf32>
    %4 = vector.broadcast %3 : vector<1x32xf32> to vector<2x32xf32>
    %5 = arith.addf %2, %4 : vector<2x32xf32>
    %6 = math.tanh %5 : vector<2x32xf32>
    %7 = arith.truncf %6 : vector<2x32xf32> to vector<2x32xbf16>
    %c0_5 = arith.constant 0 : index
    %c0_6 = arith.constant 0 : index
    %8 = vector.load %arg4[%c0_5, %c0_6] : memref<32x3xbf16, #tpu.memory_space<vmem>>, vector<32x3xbf16>
    %cst_7 = arith.constant dense<0.000000e+00> : vector<2x3xf32>
    %9 = tpu.matmul %7, %8, %cst_7 {dimension_numbers = #tpu.dot_dimension_numbers<[1], [0], [0], [1], [0, 0, 1, 1], [], []>} : vector<2x32xbf16>, vector<32x3xbf16>, vector<2x3xf32> -> vector<2x3xf32>
    %c0_8 = arith.constant 0 : index
    %c0_9 = arith.constant 0 : index
    %10 = vector.load %arg5[%c0_8, %c0_9] : memref<1x3xf32, #tpu.memory_space<vmem>>, vector<1x3xf32>
    %11 = vector.broadcast %10 : vector<1x3xf32> to vector<2x3xf32>
    %12 = arith.addf %9, %11 : vector<2x3xf32>
    %c0_10 = arith.constant 0 : index
    %c0_11 = arith.constant 0 : index
    %13 = vector.load %arg6[%c0_10, %c0_11] : memref<2x3xf32, #tpu.memory_space<vmem>>, vector<2x3xf32>
    tpu.vector_store %arg6[%c0_10, %c0_11], %12 {strides = array<i32>} : memref<2x3xf32, #tpu.memory_space<vmem>>, vector<2x3xf32>,
    return
  }
  func.func @transform_0(%arg0: i32) -> (i32, i32) {
    %c0_i32 = arith.constant 0 : i32
    %c0_i32_0 = arith.constant 0 : i32
    %c0_i32_1 = arith.constant 0 : i32
    return %c0_i32, %c0_i32_0 : i32, i32
  }
  func.func @transform_1(%arg0: i32) -> (i32, i32) {
    %c0_i32 = arith.constant 0 : i32
    %c0_i32_0 = arith.constant 0 : i32
    %c0_i32_1 = arith.constant 0 : i32
    return %c0_i32, %c0_i32_0 : i32, i32
  }
  func.func @transform_2(%arg0: i32) -> (i32, i32) {
    %c0_i32 = arith.constant 0 : i32
    %c0_i32_0 = arith.constant 0 : i32
    %c0_i32_1 = arith.constant 0 : i32
    return %c0_i32, %c0_i32_0 : i32, i32
  }
  func.func @transform_3(%arg0: i32) -> (i32, i32) {
    %c0_i32 = arith.constant 0 : i32
    %c0_i32_0 = arith.constant 0 : i32
    %c0_i32_1 = arith.constant 0 : i32
    return %c0_i32, %c0_i32_0 : i32, i32
  }
  func.func @transform_4(%arg0: i32) -> (i32, i32) {
    %c0_i32 = arith.constant 0 : i32
    %c0_i32_0 = arith.constant 0 : i32
    %c0_i32_1 = arith.constant 0 : i32
    return %c0_i32, %c0_i32_0 : i32, i32
  }
  func.func @transform_5(%arg0: i32) -> (i32, i32) {
    %c0_i32 = arith.constant 0 : i32
    %c0_i32_0 = arith.constant 0 : i32
    %c0_i32_1 = arith.constant 0 : i32
    return %c0_i32, %c0_i32_0 : i32, i32
  }
}

</mosaic_0001>

<bundles_post_ra>
// kernel: bert_classifier_forward.13
= control target key start
LH: loop header
LB: loop body
LE: loop exit
PB: predicated region body
PF: predicated region fallthrough
CT: control target
= control target key end

     0   :  { %vm19_vm0 = vcmask 785408   ;;  %v151_v0 = vmov 0.0   ;;  %vm152_vm1 = vmmov 0   ;;  %vm47_vm2 = vcmask 261120   ;;  %s195_s1 = inlined_call_operand.vmem [shape: bf16[32,96], index: 1, kind: input, shape index: {}]   ;;  %s196_s0 = inlined_call_operand.vmem [shape: bf16[16,32], index: 0, kind: input, shape index: {}]   ;;  %s197_s2 = inlined_call_operand.vmem [shape: f32[1,96], index: 2, kind: input, shape index: {}]   ;;  %s198_s3 = inlined_call_operand.vmem [shape: bf16[16,96], index: 3, kind: output, shape index: {}]  }
   0x1   :  { %138 = vmatprep.subr.bf16.mxu0 %v151_v0  ;;  %v148_v1 = vld [vmem:[%s195_s1] sm:$0xff]   ;;  %142 = vmatprep.mubr.msk.bf16.mxu0 %vm152_vm1, %v151_v0  ;;  %20 = vst.msk [vmem:[#allocation2] sm:$0xff] %vm19_vm0, %v151_v0  ;;  %21 = vst.msk [vmem:[#allocation2 + $0x8] sm:$0xff] %vm19_vm0, %v151_v0  ;;  %v149_v2 = vld [vmem:[%s195_s1 + $0x8] sm:$0xff]   ;;  %vm119_vm3 = vcmask 781312  }
   0x2   :  { %139 = vmatpush3.bf16.msra.mxu0 %v148_v1  ;;  %v150_v3 = vld [vmem:[%s196_s0] sm:$0xff]  }
   0x3   :  { %140 = vmatprep.subr.bf16.mxu0 %v151_v0  ;;  %v130_v12 = vld [vmem:[%s197_s2] ss:$0 sm:$0xff] }
   0x6   :  { %141 = vmatpush3.bf16.msra.mxu0 %v149_v2 }
   0x8   :  { %v22_v4 = vld [vmem:[#allocation2] sm:$0xff]  ;;  %v23_v6 = vld [vmem:[#allocation2 + $0x8] sm:$0xff] }
   0x9   :  { %143 = vmatmul.mubr.msk.bf16.vlgmr.msra.gmra.mrb[0].mxu0 %vm47_vm2, %v150_v3 }
  0xdc   :  { %v85_v5 = vpop.f32.mrb[0].mxu0 }
  0xdd   :  { %v92_v7 = vadd.f32 %v85_v5, %v22_v4  ;;  %v144_v8 = vpop.f32.mrb[1].mxu0 }
  0xde   :  { %v88_v9 = vpop.f32.mrb[2].mxu0 }
  0xdf   :  { %95 = vst.msk [vmem:[#allocation2] sm:$0xff] %vm19_vm0, %v92_v7  ;;  %v93_v10 = vadd.f32 %v88_v9, %v23_v6  ;;  %v145_v11 = vpop.f32.mrb[3].mxu0 }
  0xe1   :  { %96 = vst.msk [vmem:[#allocation2 + $0x8] sm:$0xff] %vm19_vm0, %v93_v10 }
  0xe6   :  { %v100_v13 = vld [vmem:[#allocation2] sm:$0xff] }
  0xe7   :  { %v109_v14 = vadd.f32 %v130_v12, %v100_v13 }
  0xe8   :  { %v101_v15 = vld [vmem:[#allocation2 + $0x8] sm:$0xff] }
  0xe9   :  { %v133_v16 = vpack.c.bf16 %v109_v14, %v109_v14  ;;  %v110_v17 = vadd.f32 %v130_v12, %v101_v15 }
  0xeb   :  { %120 = vst.msk [vmem:[%s198_s3] sm:$0xf] %vm119_vm3, %v133_v16  ;;  %v134_v18 = vpack.c.bf16 %v110_v17, %v110_v17 }
  0xed   :  { %121 = vst.msk [vmem:[%s198_s3 + $0x4] sm:$0xf] %vm119_vm3, %v134_v18 }

// kernel: bert_classifier_forward.12
= control target key start
LH: loop header
LB: loop body
LE: loop exit
PB: predicated region body
PF: predicated region fallthrough
CT: control target
= control target key end

     0   :  { %vm18_vm0 = vcmask 261120   ;;  %vm72_vm1 = vcmask 257024   ;;  %s132_s0 = inlined_call_operand.vmem [shape: bf16[16,32], index: 0, kind: input, shape index: {}]   ;;  %s133_s1 = inlined_call_operand.vmem [shape: f32[1,32], index: 1, kind: input, shape index: {}]   ;;  %s134_s2 = inlined_call_operand.vmem [shape: f32[1,32], index: 2, kind: input, shape index: {}]   ;;  %s135_s3 = inlined_call_operand.vmem [shape: bf16[16,32], index: 3, kind: output, shape index: {}]  }
   0x1   :  { %v86_v0 = vld [vmem:[%s132_s0] sm:$0xff]  }
   0x2   :  { %v87_v1 = vunpack.c.l.bf16 %v86_v0  ;;  %v88_v2 = vunpack.c.h.bf16 %v86_v0  ;;  %v79_v22 = vld [vmem:[%s133_s1] ss:$0 sm:$0xff] }
   0x3   :  { %v80_v24 = vld [vmem:[%s134_s2] ss:$0 sm:$0xff] }
   0x4   :  { %v19_v3 = vsel %vm18_vm0, %v87_v1, 0.0  ;;  %v22_v4 = vsel %vm18_vm0, %v88_v2, 0.0 }
   0x5   :  { %20 = vadd.xlane.f32.xlu0 %v19_v3 }
   0x9   :  { %23 = vadd.xlane.f32.xlu0 %v22_v4 }
  0x92   :  { %v21_v5 = vpop.xlane.xlu0 %20 }
  0x93   :  { %v26_v6 = vmul.f32 0.03125, %v21_v5 }
  0x95   :  { %v28_v7 = vsub.f32 %v87_v1, %v26_v6 }
  0x96   :  { %v24_v8 = vpop.xlane.xlu0 %23 }
  0x97   :  { %v27_v9 = vmul.f32 0.03125, %v24_v8  ;;  %v30_v10 = vmul.f32 %v28_v7, %v28_v7 }
  0x99   :  { %v29_v11 = vsub.f32 %v88_v2, %v27_v9  ;;  %v32_v12 = vsel %vm18_vm0, %v30_v10, 0.0 }
  0x9a   :  { %33 = vadd.xlane.f32.xlu1 %v32_v12 }
  0x9b   :  { %v31_v13 = vmul.f32 %v29_v11, %v29_v11 }
  0x9d   :  { %v35_v14 = vsel %vm18_vm0, %v31_v13, 0.0 }
  0x9e   :  { %36 = vadd.xlane.f32.xlu1 %v35_v14 }
 0x127   :  { %v34_v15 = vpop.xlane.xlu1 %33 }
 0x128   :  { %v38_v16 = vmul.f32 0.03125, %v34_v15 }
 0x12a   :  { %v40_v17 = vadd.f32 1e-12, %v38_v16 }
 0x12b   :  { %v37_v18 = vpop.xlane.xlu1 %36 }
 0x12c   :  { %89 = vrsqrt.f32 %v40_v17  ;;  %v39_v19 = vmul.f32 0.03125, %v37_v18 }
 0x12e   :  { %v41_v20 = vadd.f32 1e-12, %v39_v19 }
 0x130   :  { %91 = vrsqrt.f32 %v41_v20 }
 0x136   :  { %v90_v21 = vpop.eup %89 }
 0x137   :  { %v44_v23 = vmul.f32 %v90_v21, %v28_v7 }
 0x139   :  { %v53_v25 = vmul.f32 %v79_v22, %v44_v23 }
 0x13a   :  { %v92_v26 = vpop.eup %91 }
 0x13b   :  { %v62_v27 = vadd.f32 %v80_v24, %v53_v25  ;;  %v45_v28 = vmul.f32 %v92_v26, %v29_v11 }
 0x13d   :  { %v83_v29 = vpack.c.bf16 %v62_v27, %v62_v27  ;;  %v54_v30 = vmul.f32 %v79_v22, %v45_v28 }
 0x13f   :  { %73 = vst.msk [vmem:[%s135_s3] sm:$0xf] %vm72_vm1, %v83_v29  ;;  %v63_v31 = vadd.f32 %v80_v24, %v54_v30 }
 0x141   :  { %v84_v32 = vpack.c.bf16 %v63_v31, %v63_v31 }
 0x143   :  { %74 = vst.msk [vmem:[%s135_s3 + $0x4] sm:$0xf] %vm72_vm1, %v84_v32 }

// kernel: bert_classifier_forward.15
= control target key start
LH: loop header
LB: loop body
LE: loop exit
PB: predicated region body
PF: predicated region fallthrough
CT: control target
= control target key end

     0   :  { %vm28_vm0 = vcmask 261120   ;;  %v220_v0 = vmov 0.0   ;;  %vm221_vm1 = vmmov 0   ;;  %vm178_vm2 = vcmask 257024   ;;  %s293_s1 = inlined_call_operand.vmem [shape: bf16[32,32], index: 1, kind: input, shape index: {}]   ;;  %s294_s0 = inlined_call_operand.vmem [shape: bf16[16,32], index: 0, kind: input, shape index: {}]   ;;  %s295_s3 = inlined_call_operand.vmem [shape: bf16[16,32], index: 3, kind: input, shape index: {}]   ;;  %s296_s2 = inlined_call_operand.vmem [shape: f32[1,32], index: 2, kind: input, shape index: {}]   ;;  %s297_s4 = inlined_call_operand.vmem [shape: f32[1,32], index: 4, kind: input, shape index: {}]   ;;  %s298_s5 = inlined_call_operand.vmem [shape: f32[1,32], index: 5, kind: input, shape index: {}]   ;;  %s299_s6 = inlined_call_operand.vmem [shape: bf16[16,32], index: 6, kind: output, shape index: {}]  }
   0x1   :  { %203 = vmatprep.subr.bf16.mxu0 %v220_v0  ;;  %v213_v1 = vld [vmem:[%s293_s1] sm:$0xff]   ;;  %207 = vmatprep.mubr.msk.bf16.mxu0 %vm221_vm1, %v220_v0  ;;  %29 = vst.msk [vmem:[#allocation2] sm:$0xff] %vm28_vm0, %v220_v0  ;;  %30 = vst.msk [vmem:[#allocation2 + $0x8] sm:$0xff] %vm28_vm0, %v220_v0  ;;  %v214_v2 = vld [vmem:[%s293_s1 + $0x8] sm:$0xff]  }
   0x2   :  { %204 = vmatpush3.bf16.msra.mxu0 %v213_v1  ;;  %v215_v3 = vld [vmem:[%s294_s0] sm:$0xff]  }
   0x3   :  { %205 = vmatprep.subr.bf16.mxu0 %v220_v0  ;;  %v197_v12 = vld [vmem:[%s295_s3] sm:$0xff]  }
   0x4   :  { %v189_v13 = vld [vmem:[%s296_s2] ss:$0 sm:$0xff]  ;;  %v198_v14 = vunpack.c.l.bf16 %v197_v12  ;;  %v199_v17 = vunpack.c.h.bf16 %v197_v12 }
   0x5   :  { %v190_v41 = vld [vmem:[%s297_s4] ss:$0 sm:$0xff] }
   0x6   :  { %206 = vmatpush3.bf16.msra.mxu0 %v214_v2  ;;  %v191_v43 = vld [vmem:[%s298_s5] ss:$0 sm:$0xff] }
   0x8   :  { %v31_v4 = vld [vmem:[#allocation2] sm:$0xff]  ;;  %v32_v6 = vld [vmem:[#allocation2 + $0x8] sm:$0xff] }
   0x9   :  { %208 = vmatmul.mubr.msk.bf16.vlgmr.msra.gmra.mrb[0].mxu0 %vm28_vm0, %v215_v3 }
  0xdc   :  { %v94_v5 = vpop.f32.mrb[0].mxu0 }
  0xdd   :  { %v101_v7 = vadd.f32 %v94_v5, %v31_v4  ;;  %v209_v8 = vpop.f32.mrb[1].mxu0 }
  0xde   :  { %v97_v9 = vpop.f32.mrb[2].mxu0 }
  0xdf   :  { %103 = vst.msk [vmem:[#allocation2] sm:$0xff] %vm28_vm0, %v101_v7  ;;  %v102_v10 = vadd.f32 %v97_v9, %v32_v6  ;;  %v210_v11 = vpop.f32.mrb[3].mxu0 }
  0xe1   :  { %104 = vst.msk [vmem:[#allocation2 + $0x8] sm:$0xff] %vm28_vm0, %v102_v10 }
  0xe6   :  { %v108_v15 = vld [vmem:[#allocation2] sm:$0xff] }
  0xe7   :  { %v117_v16 = vadd.f32 %v189_v13, %v108_v15 }
  0xe8   :  { %v109_v18 = vld [vmem:[#allocation2 + $0x8] sm:$0xff] }
  0xe9   :  { %v123_v19 = vadd.f32 %v198_v14, %v117_v16  ;;  %v118_v20 = vadd.f32 %v189_v13, %v109_v18 }
  0xeb   :  { %v125_v21 = vsel %vm28_vm0, %v123_v19, 0.0  ;;  %v124_v22 = vadd.f32 %v199_v17, %v118_v20 }
  0xec   :  { %126 = vadd.xlane.f32.xlu0 %v125_v21 }
  0xed   :  { %v128_v23 = vsel %vm28_vm0, %v124_v22, 0.0 }
  0xf0   :  { %129 = vadd.xlane.f32.xlu0 %v128_v23 }
 0x179   :  { %v127_v24 = vpop.xlane.xlu0 %126 }
 0x17a   :  { %v132_v25 = vmul.f32 0.03125, %v127_v24 }
 0x17c   :  { %v134_v26 = vsub.f32 %v123_v19, %v132_v25 }
 0x17d   :  { %v130_v27 = vpop.xlane.xlu0 %129 }
 0x17e   :  { %v133_v28 = vmul.f32 0.03125, %v130_v27  ;;  %v136_v29 = vmul.f32 %v134_v26, %v134_v26 }
 0x180   :  { %v135_v30 = vsub.f32 %v124_v22, %v133_v28  ;;  %v138_v31 = vsel %vm28_vm0, %v136_v29, 0.0 }
 0x181   :  { %139 = vadd.xlane.f32.xlu1 %v138_v31 }
 0x182   :  { %v137_v32 = vmul.f32 %v135_v30, %v135_v30 }
 0x184   :  { %v141_v33 = vsel %vm28_vm0, %v137_v32, 0.0 }
 0x185   :  { %142 = vadd.xlane.f32.xlu1 %v141_v33 }
 0x20e   :  { %v140_v34 = vpop.xlane.xlu1 %139 }
 0x20f   :  { %v144_v35 = vmul.f32 0.03125, %v140_v34 }
 0x211   :  { %v146_v36 = vadd.f32 1e-12, %v144_v35 }
 0x212   :  { %v143_v37 = vpop.xlane.xlu1 %142 }
 0x213   :  { %216 = vrsqrt.f32 %v146_v36  ;;  %v145_v38 = vmul.f32 0.03125, %v143_v37 }
 0x215   :  { %v147_v39 = vadd.f32 1e-12, %v145_v38 }
 0x217   :  { %218 = vrsqrt.f32 %v147_v39 }
 0x21d   :  { %v217_v40 = vpop.eup %216 }
 0x21e   :  { %v150_v42 = vmul.f32 %v217_v40, %v134_v26 }
 0x220   :  { %v159_v44 = vmul.f32 %v190_v41, %v150_v42 }
 0x221   :  { %v219_v45 = vpop.eup %218 }
 0x222   :  { %v168_v46 = vadd.f32 %v191_v43, %v159_v44  ;;  %v151_v47 = vmul.f32 %v219_v45, %v135_v30 }
 0x224   :  { %v194_v48 = vpack.c.bf16 %v168_v46, %v168_v46  ;;  %v160_v49 = vmul.f32 %v190_v41, %v151_v47 }
 0x226   :  { %179 = vst.msk [vmem:[%s299_s6] sm:$0xf] %vm178_vm2, %v194_v48  ;;  %v169_v50 = vadd.f32 %v191_v43, %v160_v49 }
 0x228   :  { %v195_v51 = vpack.c.bf16 %v169_v50, %v169_v50 }
 0x22a   :  { %180 = vst.msk [vmem:[%s299_s6 + $0x4] sm:$0xf] %vm178_vm2, %v195_v51 }

// kernel: bert_classifier_forward.14
= control target key start
LH: loop header
LB: loop body
LE: loop exit
PB: predicated region body
PF: predicated region fallthrough
CT: control target
= control target key end

     0   :  { %s858_s9 = smov 0   ;;  %s957_s0 = inlined_call_operand.vmem [shape: bf16[2,8,96], index: 0, kind: input, shape index: {}]   ;;  %s958_s1 = inlined_call_operand.vmem [shape: f32[2,1,8], index: 1, kind: input, shape index: {}]   ;;  %s959_s2 = inlined_call_operand.vmem [shape: bf16[2,8,32], index: 2, kind: output, shape index: {}]  }
   0x1 LB: > { %s695_s10 = sadd.s32 4294967295, %s825_s9   ;;  %p699_p0 = scmp.ge.s32.totalorder %s825_s9, 1  ;;  %s825_s9 = sphi %s858_s9, %s12_s9  }
   0x2   : > { %p119_p1 = scmp.lt.s32.totalorder %s825_s9, 3 }
   0x4   : > { %p120_p2 = pnand %p699_p0, %p119_p1 }
   0x5   : > { %p142_p3 = scmp.lt.s32.totalorder (!%p120_p2), %s695_s10, 1  ;;  %v827_v0 = vmov (!%p120_p2), 0.0   ;;  %vm828_vm0 = vmmov (!%p120_p2), 0   ;;  %s829_s15 = smov (!%p120_p2), 96   ;;  %vm161_vm1 = vcmask (!%p120_p2), 64512   ;;  %vm233_vm2 = vcmask (!%p120_p2), 1043456  }
   0x6   : > { %123 = sbr.rel (%p120_p2) target bundleno = 1606 (0x646), region = 28  ;;  %730 = vmatprep.subr.bf16.mxu0 (!%p120_p2), %v827_v0  ;;  %732 = vmatprep.mubr.msk.bf16.mxu0 (!%p120_p2), %vm828_vm0, %v827_v0  ;;  %s830_s16 = smov (!%p120_p2), 64   ;;  %vm626_vm3 = vcmask (!%p120_p2), 130048   ;;  %vm628_vm4 = vcmask (!%p120_p2), 195584   ;;  %vm631_vm5 = vcmask (!%p120_p2), 257024  }
   0x7   : > { %736 = vmatprep.subr.bf16.mxu1 (!%p120_p2), %v827_v0  ;;  %738 = vmatprep.mubr.msk.bf16.mxu1 (!%p120_p2), %vm828_vm0, %v827_v0  ;;  %s831_s17 = smov (!%p120_p2), 88   ;;  %s832_s21 = smov (!%p120_p2), 72  }
   0x8   : > { %s833_s22 = smov (!%p120_p2), 120   ;;  %s834_s23 = smov (!%p120_p2), 80  }
   0x9   : > { %s835_s24 = smov (!%p120_p2), 112   ;;  %s836_s25 = smov (!%p120_p2), 104  }
   0xa   : > { %s837_s26 = smov (!%p120_p2), 56   ;;  %s838_s27 = smov (!%p120_p2), 48  }
   0xb   : > { %s839_s28 = smov (!%p120_p2), 40   ;;  %s840_s29 = smov (!%p120_p2), 8  }
   0xc   : > { %s841_s30 = smov (!%p120_p2), 16   ;;  %s842_s3 = smov (!%p120_p2), 24  }
   0xd   : > { %s961_s10 = smov (!%p142_p3, %s695_s10), 1 }
   0xe   : > { %s700_s11 = sshll.u32 %s961_s10, 2  ;;  %s148_s20 = scalar_lea.vmem %s958_s1, %s961_s10 }
   0xf   : > { %s145_s14 = scalar_lea.vmem %s957_s0, %s700_s11  ;;  %v894_v6 = vld [vmem:[%s148_s20] ss:$0 sm:$0xff]  ;;  %s152_s6 = scalar_lea.vmem %s959_s2, %s700_s11 }
  0x10   : > { %v155_v1 = vld [vmem:[%s145_s14] sm:$0xf] }
  0x11   : > { %v880_v2 = vcombine.low %v155_v1, %v155_v1 }
  0x13   : > { %159 = vrot.lane.b32.xlu0 %v880_v2, %s829_s15  ;;  %228 = vrot.lane.b32.xlu1 %v880_v2, %s830_s16 }
  0x17   : > { %279 = vrot.lane.b32.xlu1 %v880_v2, %s831_s17 }
  0x85   : > { %v160_v3 = vpop.permute.xlu0 %159  ;;  %v229_v13 = vpop.permute.xlu1 %228 }
  0x86   : > { %v166_v4 = vsel %vm161_vm1, %v160_v3, 0  ;;  %v235_v14 = vsel %vm233_vm2, %v229_v13, 0 }
  0x87   : > { %731 = vmatpush3.bf16.xpose.msra.mxu0 %v166_v4  ;;  %737 = vmatpush3.bf16.msra.mxu1 %v235_v14 }
  0x88   : > { %748 = vmatprep.subr.bf16.mxu0 %v827_v0  ;;  %742 = vmatprep.subr.bf16.mxu1 %v827_v0 }
  0x89   : > { %v280_v20 = vpop.permute.xlu1 %279 }
  0x8a   : > { %v285_v26 = vsel %vm161_vm1, %v280_v20, 0 }
  0x8e   : > { %733 = vmatmul.mubr.msk.bf16.vlgmr.msra.gmra.mrb[0].mxu0 %vm161_vm1, %v155_v1 }
  0x8f   : > { %750 = vmatprep.mubr.msk.bf16.mxu0 %vm828_vm0, %v827_v0 }
 0x161   : > { %v202_v5 = vpop.f32.mrb[0].mxu0 }
 0x162   : > { %v208_v7 = vmul.f32 0.35355338, %v202_v5  ;;  %v734_v8 = vpop.f32.mrb[1].mxu0 }
 0x163   : > { %v205_v9 = vpop.f32.mrb[2].mxu0 }
 0x164   : > { %v735_v10 = vpop.f32.mrb[3].mxu0  ;;  %v215_v11 = vadd.f32 %v894_v6, %v208_v7 }
 0x166   : > { %v216_v12 = vsel %vm161_vm1, %v215_v11, -inf }
 0x167   : > { %217 = vmax.xlane.f32.xlu0 %v216_v12 }
 0x17d   : > { %503 = vrot.lane.b32.xlu0 %v880_v2, %s832_s21 }
 0x1f4   : > { %v218_v15 = vpop.xlane.xlu0 %217 }
 0x1f5   : > { %v219_v16 = vsub.f32 %v215_v11, %v218_v15 }
 0x1f7   : > { %v220_v17 = vmul.f32 1.442695, %v219_v16 }
 0x1f8   : > { %v504_v29 = vpop.permute.xlu0 %503 }
 0x1f9   : > { %803 = vpow2.f32 %v220_v17  ;;  %v509_v31 = vsel %vm161_vm1, %v504_v29, 0 }
 0x203   : > { %v804_v18 = vpop.eup %803 }
 0x204   : > { %v222_v19 = vsel %vm161_vm1, %v804_v18, 0.0 }
 0x205   : > { %223 = vadd.xlane.f32.xlu1 %v222_v19 }
 0x216   : > { %277 = vrot.lane.b32.xlu1 %v880_v2, %s833_s22 }
 0x21a   : > { %391 = vrot.lane.b32.xlu1 %v880_v2, %s834_s23 }
 0x21e   : > { %389 = vrot.lane.b32.xlu1 %v880_v2, %s835_s24 }
 0x222   : > { %501 = vrot.lane.b32.xlu1 %v880_v2, %s836_s25 }
 0x292   : > { %v224_v21 = vpop.xlane.xlu1 %223 }
 0x293   : > { %805 = vrcp.f32 %v224_v21 }
 0x296   : > { %v278_v24 = vpop.permute.xlu1 %277 }
 0x29a   : > { %v392_v27 = vpop.permute.xlu1 %391 }
 0x29b   : > { %v397_v28 = vsel %vm161_vm1, %v392_v27, 0 }
 0x29d   : > { %v806_v22 = vpop.eup %805 }
 0x29e   : > { %v226_v23 = vmul.f32 %v806_v22, %v804_v18  ;;  %v390_v30 = vpop.permute.xlu1 %389 }
 0x2a0   : > { %v227_v25 = vpack.c.bf16 %v226_v23, %v226_v23 }
 0x2a2   : > { %739 = vmatmul.mubr.msk.bf16.vlgmr.msra.gmra.mrb[0].mxu1 %vm161_vm1, %v227_v25  ;;  %v502_v32 = vpop.permute.xlu1 %501 }
 0x2a3   : > { %743 = vmatpush3.bf16.xpose.msra.mxu1 %v285_v26  ;;  %744 = vmatprep.mubr.msk.bf16.mxu1 %vm828_vm0, %v827_v0 }
 0x2a4   : > { %754 = vmatprep.subr.bf16.mxu1 %v827_v0 }
 0x2aa   : > { %745 = vmatmul.mubr.msk.bf16.vlgmr.msra.gmra.mrb[4].mxu1 %vm161_vm1, %v278_v24 }
 0x2ab   : > { %755 = vmatpush3.bf16.xpose.msra.mxu1 %v397_v28  ;;  %756 = vmatprep.mubr.msk.bf16.mxu1 %vm828_vm0, %v827_v0 }
 0x2ac   : > { %766 = vmatprep.subr.bf16.mxu1 %v827_v0 }
 0x2b2   : > { %757 = vmatmul.mubr.msk.bf16.vlgmr.msra.gmra.mrb[8].mxu1 %vm161_vm1, %v390_v30 }
 0x2b3   : > { %767 = vmatpush3.bf16.xpose.msra.mxu1 %v509_v31  ;;  %768 = vmatprep.mubr.msk.bf16.mxu1 %vm828_vm0, %v827_v0 }
 0x2ba   : > { %769 = vmatmul.mubr.msk.bf16.vlgmr.msra.gmra.mrb[12].mxu1 %vm161_vm1, %v502_v32 }
 0x375   : > { %v921_v33 = vpop.f32.mrb[0].mxu1 }
 0x376   : > { %v740_v34 = vpop.f32.mrb[1].mxu1 }
 0x377   : > { %v274_v35 = vpop.f32.mrb[2].mxu1 }
 0x378   : > { %v741_v36 = vpop.f32.mrb[3].mxu1 }
 0x37d   : > { %v321_v37 = vpop.f32.mrb[4].mxu1 }
 0x37e   : > { %v327_v38 = vmul.f32 0.35355338, %v321_v37  ;;  %v746_v39 = vpop.f32.mrb[5].mxu1 }
 0x37f   : > { %v324_v40 = vpop.f32.mrb[6].mxu1 }
 0x380   : > { %v747_v41 = vpop.f32.mrb[7].mxu1  ;;  %v328_v42 = vadd.f32 %v894_v6, %v327_v38 }
 0x382   : > { %v329_v43 = vsel %vm161_vm1, %v328_v42, -inf }
 0x383   : > { %330 = vmax.xlane.f32.xlu1 %v329_v43 }
 0x385   : > { %v433_v44 = vpop.f32.mrb[8].mxu1 }
 0x386   : > { %v439_v45 = vmul.f32 0.35355338, %v433_v44  ;;  %v758_v46 = vpop.f32.mrb[9].mxu1 }
 0x387   : > { %v436_v47 = vpop.f32.mrb[10].mxu1 }
 0x388   : > { %v440_v48 = vadd.f32 %v894_v6, %v439_v45  ;;  %v759_v49 = vpop.f32.mrb[11].mxu1 }
 0x38a   : > { %v441_v50 = vsel %vm161_vm1, %v440_v48, -inf }
 0x38b   : > { %442 = vmax.xlane.f32.xlu0 %v441_v50 }
 0x38d   : > { %v545_v51 = vpop.f32.mrb[12].mxu1 }
 0x38e   : > { %v551_v52 = vmul.f32 0.35355338, %v545_v51  ;;  %v770_v53 = vpop.f32.mrb[13].mxu1 }
 0x38f   : > { %v548_v54 = vpop.f32.mrb[14].mxu1 }
 0x390   : > { %v552_v55 = vadd.f32 %v894_v6, %v551_v52  ;;  %v771_v56 = vpop.f32.mrb[15].mxu1 }
 0x392   : > { %v553_v57 = vsel %vm161_vm1, %v552_v55, -inf }
 0x393   : > { %554 = vmax.xlane.f32.xlu1 %v553_v57 }
 0x410   : > { %v331_v58 = vpop.xlane.xlu1 %330 }
 0x411   : > { %v332_v59 = vsub.f32 %v328_v42, %v331_v58 }
 0x413   : > { %v333_v60 = vmul.f32 1.442695, %v332_v59 }
 0x415   : > { %807 = vpow2.f32 %v333_v60 }
 0x418   : > { %v443_v6 = vpop.xlane.xlu0 %442 }
 0x419   : > { %v444_v7 = vsub.f32 %v440_v48, %v443_v6 }
 0x41b   : > { %v445_v8 = vmul.f32 1.442695, %v444_v7 }
 0x41f   : > { %v808_v61 = vpop.eup %807 }
 0x420   : > { %v555_v62 = vpop.xlane.xlu1 %554  ;;  %v335_v63 = vsel %vm161_vm1, %v808_v61, 0.0 }
 0x421   : > { %v556_v1 = vsub.f32 %v552_v55, %v555_v62  ;;  %336 = vadd.xlane.f32.xlu1 %v335_v63 }
 0x423   : > { %v557_v3 = vmul.f32 1.442695, %v556_v1 }
 0x425   : > { %809 = vpow2.f32 %v557_v3 }
 0x426   : > { %811 = vpow2.f32 %v445_v8 }
 0x42f   : > { %v810_v4 = vpop.eup %809 }
 0x430   : > { %v559_v5 = vsel %vm161_vm1, %v810_v4, 0.0  ;;  %v812_v9 = vpop.eup %811 }
 0x431   : > { %560 = vadd.xlane.f32.xlu0 %v559_v5  ;;  %v447_v10 = vsel %vm161_vm1, %v812_v9, 0.0 }
 0x432   : > { %341 = vrot.lane.b32.xlu1 %v880_v2, %s837_s26 }
 0x447   : > { %453 = vrot.lane.b32.xlu0 %v880_v2, %s838_s27 }
 0x456   : > { %448 = vadd.xlane.f32.xlu1 %v447_v10 }
 0x467   : > { %565 = vrot.lane.b32.xlu1 %v880_v2, %s839_s28 }
 0x4ae   : > { %v337_v11 = vpop.xlane.xlu1 %336 }
 0x4af   : > { %813 = vrcp.f32 %v337_v11 }
 0x4b2   : > { %v342_v12 = vpop.permute.xlu1 %341 }
 0x4b3   : > { %v347_v13 = vsel %vm233_vm2, %v342_v12, 0 }
 0x4b4   : > { %749 = vmatpush3.bf16.msra.mxu0 %v347_v13 }
 0x4b5   : > { %760 = vmatprep.subr.bf16.mxu0 %v827_v0 }
 0x4b9   : > { %v814_v14 = vpop.eup %813 }
 0x4ba   : > { %v339_v15 = vmul.f32 %v814_v14, %v808_v61 }
 0x4bc   : > { %v340_v16 = vpack.c.bf16 %v339_v15, %v339_v15 }
 0x4be   : > { %751 = vmatmul.mubr.msk.bf16.vlgmr.msra.gmra.mrb[4].mxu0 %vm161_vm1, %v340_v16  ;;  %v561_v17 = vpop.xlane.xlu0 %560 }
 0x4bf   : > { %762 = vmatprep.mubr.msk.bf16.mxu0 %vm828_vm0, %v827_v0 }
 0x4c2   : > { %v454_v18 = vpop.permute.xlu0 %453 }
 0x4c3   : > { %v459_v2 = vsel %vm233_vm2, %v454_v18, 0 }
 0x4c4   : > { %761 = vmatpush3.bf16.msra.mxu0 %v459_v2 }
 0x4c5   : > { %772 = vmatprep.subr.bf16.mxu0 %v827_v0 }
 0x4e3   : > { %v449_v19 = vpop.xlane.xlu1 %448 }
 0x4e4   : > { %815 = vrcp.f32 %v449_v19 }
 0x4e5   : > { %817 = vrcp.f32 %v561_v17 }
 0x4e7   : > { %v566_v21 = vpop.permute.xlu1 %565 }
 0x4e8   : > { %v571_v23 = vsel %vm233_vm2, %v566_v21, 0 }
 0x4ee   : > { %v816_v20 = vpop.eup %815 }
 0x4ef   : > { %v451_v22 = vmul.f32 %v816_v20, %v812_v9  ;;  %v818_v25 = vpop.eup %817 }
 0x4f0   : > { %v563_v26 = vmul.f32 %v818_v25, %v810_v4 }
 0x4f1   : > { %v452_v24 = vpack.c.bf16 %v451_v22, %v451_v22 }
 0x4f2   : > { %v564_v27 = vpack.c.bf16 %v563_v26, %v563_v26 }
 0x4f3   : > { %763 = vmatmul.mubr.msk.bf16.vlgmr.msra.gmra.mrb[8].mxu0 %vm161_vm1, %v452_v24 }
 0x4f4   : > { %773 = vmatpush3.bf16.msra.mxu0 %v571_v23  ;;  %774 = vmatprep.mubr.msk.bf16.mxu0 %vm828_vm0, %v827_v0 }
 0x4fb   : > { %775 = vmatmul.mubr.msk.bf16.vlgmr.msra.gmra.mrb[12].mxu0 %vm161_vm1, %v564_v27 }
 0x591   : > { %v383_v28 = vpop.f32.mrb[4].mxu0 }
 0x592   : > { %614 = vrot.lane.b32.xlu1 %v383_v28, %s840_s29  ;;  %v752_v29 = vpop.f32.mrb[5].mxu0 }
 0x593   : > { %v386_v30 = vpop.f32.mrb[6].mxu0 }
 0x594   : > { %v753_v31 = vpop.f32.mrb[7].mxu0 }
 0x5c6   : > { %v495_v32 = vpop.f32.mrb[8].mxu0 }
 0x5c7   : > { %618 = vrot.lane.b32.xlu0 %v495_v32, %s841_s30  ;;  %v764_v34 = vpop.f32.mrb[9].mxu0 }
 0x5c8   : > { %v498_v35 = vpop.f32.mrb[10].mxu0 }
 0x5c9   : > { %v765_v36 = vpop.f32.mrb[11].mxu0 }
 0x5ce   : > { %v607_v37 = vpop.f32.mrb[12].mxu0 }
 0x5cf   : > { %622 = vrot.lane.b32.xlu1 %v607_v37, %s842_s3  ;;  %v776_v0 = vpop.f32.mrb[13].mxu0 }
 0x5d0   : > { %v610_v38 = vpop.f32.mrb[14].mxu0 }
 0x5d1   : > { %v777_v39 = vpop.f32.mrb[15].mxu0 }
 0x604   : > { %v615_v40 = vpop.permute.xlu1 %614 }
 0x605   : > { %v625_v42 = vsel %vm161_vm1, %v921_v33, %v615_v40 }
 0x639   : > { %v619_v41 = vpop.permute.xlu0 %618 }
 0x63a   : > { %v627_v43 = vsel %vm626_vm3, %v625_v42, %v619_v41 }
 0x641   : > { %v623_v44 = vpop.permute.xlu1 %622 }
 0x642   : > { %v629_v45 = vsel %vm628_vm4, %v627_v43, %v623_v44 }
 0x643   : > { %v630_v46 = vpack.c.bf16 %v629_v45, %v629_v45 }
 0x645   : > { %632 = vst.msk [vmem:[%s152_s6] sm:$0xf] %vm631_vm5, %v630_v46 }
 0x646 PF: > { %s12_s9 = sadd.s32 1, %s825_s9  }
 0x647   : > { %p9_p4 = scmp.ge.s32.totalorder %s12_s9, 4  }
 0x649   :  { %11 = sbr.rel (!%p9_p4) target bundleno = 1 (0x1), region = 61 }

// kernel: bert_classifier_forward.16
= control target key start
LH: loop header
LB: loop body
LE: loop exit
PB: predicated region body
PF: predicated region fallthrough
CT: control target
= control target key end

     0   :  { %vm19_vm0 = vcmask 523264   ;;  %v173_v0 = vmov 0.0   ;;  %vm174_vm1 = vmmov 0   ;;  %vm47_vm2 = vcmask 261120   ;;  %s217_s1 = inlined_call_operand.vmem [shape: bf16[32,64], index: 1, kind: input, shape index: {}]   ;;  %s218_s0 = inlined_call_operand.vmem [shape: bf16[16,32], index: 0, kind: input, shape index: {}]   ;;  %s219_s2 = inlined_call_operand.vmem [shape: f32[1,64], index: 2, kind: input, shape index: {}]   ;;  %s220_s3 = inlined_call_operand.vmem [shape: bf16[16,64], index: 3, kind: output, shape index: {}]  }
   0x1   :  { %156 = vmatprep.subr.bf16.mxu0 %v173_v0  ;;  %v166_v1 = vld [vmem:[%s217_s1] sm:$0xff]   ;;  %160 = vmatprep.mubr.msk.bf16.mxu0 %vm174_vm1, %v173_v0  ;;  %20 = vst.msk [vmem:[#allocation2] sm:$0xff] %vm19_vm0, %v173_v0  ;;  %21 = vst.msk [vmem:[#allocation2 + $0x8] sm:$0xff] %vm19_vm0, %v173_v0  ;;  %v167_v2 = vld [vmem:[%s217_s1 + $0x8] sm:$0xff]   ;;  %vm137_vm3 = vcmask 519168  }
   0x2   :  { %157 = vmatpush3.bf16.msra.mxu0 %v166_v1  ;;  %v168_v3 = vld [vmem:[%s218_s0] sm:$0xff]  }
   0x3   :  { %158 = vmatprep.subr.bf16.mxu0 %v173_v0  ;;  %v148_v12 = vld [vmem:[%s219_s2] ss:$0 sm:$0xff] }
   0x6   :  { %159 = vmatpush3.bf16.msra.mxu0 %v167_v2 }
   0x8   :  { %v22_v4 = vld [vmem:[#allocation2] sm:$0xff]  ;;  %v23_v6 = vld [vmem:[#allocation2 + $0x8] sm:$0xff] }
   0x9   :  { %161 = vmatmul.mubr.msk.bf16.vlgmr.msra.gmra.mrb[0].mxu0 %vm47_vm2, %v168_v3 }
  0xdc   :  { %v85_v5 = vpop.f32.mrb[0].mxu0 }
  0xdd   :  { %v92_v7 = vadd.f32 %v85_v5, %v22_v4  ;;  %v162_v8 = vpop.f32.mrb[1].mxu0 }
  0xde   :  { %v88_v9 = vpop.f32.mrb[2].mxu0 }
  0xdf   :  { %95 = vst.msk [vmem:[#allocation2] sm:$0xff] %vm19_vm0, %v92_v7  ;;  %v93_v10 = vadd.f32 %v88_v9, %v23_v6  ;;  %v163_v11 = vpop.f32.mrb[3].mxu0 }
  0xe1   :  { %96 = vst.msk [vmem:[#allocation2 + $0x8] sm:$0xff] %vm19_vm0, %v93_v10 }
  0xe6   :  { %v100_v13 = vld [vmem:[#allocation2] sm:$0xff] }
  0xe7   :  { %v109_v14 = vadd.f32 %v148_v12, %v100_v13 }
  0xe8   :  { %v101_v15 = vld [vmem:[#allocation2 + $0x8] sm:$0xff] }
  0xe9   :  { %v113_v16 = vmul.f32 0.044715, %v109_v14  ;;  %v110_v17 = vadd.f32 %v148_v12, %v101_v15  ;;  %v111_v28 = vmul.f32 0.5, %v109_v14 }
  0xeb   :  { %v115_v18 = vmul.f32 %v113_v16, %v109_v14  ;;  %v114_v19 = vmul.f32 0.044715, %v110_v17  ;;  %v112_v32 = vmul.f32 0.5, %v110_v17 }
  0xed   :  { %v117_v20 = vmul.f32 %v115_v18, %v109_v14  ;;  %v116_v21 = vmul.f32 %v114_v19, %v110_v17 }
  0xef   :  { %v119_v22 = vadd.f32 %v117_v20, %v109_v14  ;;  %v118_v23 = vmul.f32 %v116_v21, %v110_v17 }
  0xf1   :  { %v121_v24 = vmul.f32 0.7978846, %v119_v22  ;;  %v120_v25 = vadd.f32 %v118_v23, %v110_v17 }
  0xf3   :  { %169 = vtanh.f32 %v121_v24  ;;  %v122_v26 = vmul.f32 0.7978846, %v120_v25 }
  0xf5   :  { %171 = vtanh.f32 %v122_v26 }
  0xfd   :  { %v170_v27 = vpop.eup %169 }
  0xfe   :  { %v125_v29 = vadd.f32 1.0, %v170_v27 }
  0xff   :  { %v172_v30 = vpop.eup %171 }
 0x100   :  { %v127_v31 = vmul.f32 %v125_v29, %v111_v28  ;;  %v126_v33 = vadd.f32 1.0, %v172_v30 }
 0x102   :  { %v151_v34 = vpack.c.bf16 %v127_v31, %v127_v31  ;;  %v128_v35 = vmul.f32 %v126_v33, %v112_v32 }
 0x104   :  { %138 = vst.msk [vmem:[%s220_s3] sm:$0xf] %vm137_vm3, %v151_v34  ;;  %v152_v36 = vpack.c.bf16 %v128_v35, %v128_v35 }
 0x106   :  { %139 = vst.msk [vmem:[%s220_s3 + $0x4] sm:$0xf] %vm137_vm3, %v152_v36 }

// kernel: bert_classifier_forward.17
= control target key start
LH: loop header
LB: loop body
LE: loop exit
PB: predicated region body
PF: predicated region fallthrough
CT: control target
= control target key end

     0   :  { %vm28_vm0 = vcmask 261120   ;;  %v247_v0 = vmov 0.0   ;;  %vm248_vm1 = vmmov 0   ;;  %vm72_vm2 = vcmask 523264   ;;  %s325_s1 = inlined_call_operand.vmem [shape: bf16[64,32], index: 1, kind: input, shape index: {}]   ;;  %s326_s0 = inlined_call_operand.vmem [shape: bf16[16,64], index: 0, kind: input, shape index: {}]   ;;  %s327_s3 = inlined_call_operand.vmem [shape: bf16[16,32], index: 3, kind: input, shape index: {}]   ;;  %s328_s2 = inlined_call_operand.vmem [shape: f32[1,32], index: 2, kind: input, shape index: {}]   ;;  %s329_s4 = inlined_call_operand.vmem [shape: f32[1,32], index: 4, kind: input, shape index: {}]   ;;  %s330_s5 = inlined_call_operand.vmem [shape: f32[1,32], index: 5, kind: input, shape index: {}]   ;;  %s331_s6 = inlined_call_operand.vmem [shape: bf16[16,32], index: 6, kind: output, shape index: {}]  }
   0x1   :  { %224 = vmatprep.subr.bf16.mxu0 %v247_v0  ;;  %v238_v1 = vld [vmem:[%s325_s1] sm:$0xff]   ;;  %232 = vmatprep.mubr.msk.bf16.mxu0 %vm248_vm1, %v247_v0  ;;  %29 = vst.msk [vmem:[#allocation2] sm:$0xff] %vm28_vm0, %v247_v0  ;;  %30 = vst.msk [vmem:[#allocation2 + $0x8] sm:$0xff] %vm28_vm0, %v247_v0  ;;  %v239_v2 = vld [vmem:[%s325_s1 + $0x8] sm:$0xff]   ;;  %vm195_vm3 = vcmask 257024  }
   0x2   :  { %225 = vmatpush3.bf16.msra.mxu0 %v238_v1  ;;  %v240_v3 = vld [vmem:[%s325_s1 + $0x10] sm:$0xff]   ;;  %v241_v4 = vld [vmem:[%s325_s1 + $0x18] sm:$0xff]   ;;  %v242_v5 = vld [vmem:[%s326_s0] sm:$0xff]  }
   0x3   :  { %226 = vmatprep.subr.bf16.mxu0 %v247_v0  ;;  %v216_v14 = vld [vmem:[%s327_s3] sm:$0xff]  }
   0x4   :  { %v208_v15 = vld [vmem:[%s328_s2] ss:$0 sm:$0xff]  ;;  %v217_v16 = vunpack.c.l.bf16 %v216_v14  ;;  %v218_v19 = vunpack.c.h.bf16 %v216_v14 }
   0x5   :  { %v209_v43 = vld [vmem:[%s329_s4] ss:$0 sm:$0xff] }
   0x6   :  { %227 = vmatpush3.bf16.msra.mxu0 %v239_v2  ;;  %v210_v45 = vld [vmem:[%s330_s5] ss:$0 sm:$0xff] }
   0x7   :  { %228 = vmatprep.subr.bf16.mxu0 %v247_v0 }
   0x8   :  { %v31_v6 = vld [vmem:[#allocation2] sm:$0xff]  ;;  %v32_v8 = vld [vmem:[#allocation2 + $0x8] sm:$0xff] }
   0xa   :  { %229 = vmatpush3.bf16.msra.mxu0 %v240_v3 }
   0xb   :  { %230 = vmatprep.subr.bf16.mxu0 %v247_v0 }
   0xe   :  { %231 = vmatpush3.bf16.msra.mxu0 %v241_v4 }
  0x11   :  { %233 = vmatmul.mubr.msk.bf16.vlgmr.msra.gmra.mrb[0].mxu0 %vm72_vm2, %v242_v5 }
  0xe4   :  { %v110_v7 = vpop.f32.mrb[0].mxu0 }
  0xe5   :  { %v117_v9 = vadd.f32 %v110_v7, %v31_v6  ;;  %v234_v10 = vpop.f32.mrb[1].mxu0 }
  0xe6   :  { %v113_v11 = vpop.f32.mrb[2].mxu0 }
  0xe7   :  { %120 = vst.msk [vmem:[#allocation2] sm:$0xff] %vm28_vm0, %v117_v9  ;;  %v118_v12 = vadd.f32 %v113_v11, %v32_v8  ;;  %v235_v13 = vpop.f32.mrb[3].mxu0 }
  0xe9   :  { %121 = vst.msk [vmem:[#allocation2 + $0x8] sm:$0xff] %vm28_vm0, %v118_v12 }
  0xee   :  { %v125_v17 = vld [vmem:[#allocation2] sm:$0xff] }
  0xef   :  { %v134_v18 = vadd.f32 %v208_v15, %v125_v17 }
  0xf0   :  { %v126_v20 = vld [vmem:[#allocation2 + $0x8] sm:$0xff] }
  0xf1   :  { %v140_v21 = vadd.f32 %v217_v16, %v134_v18  ;;  %v135_v22 = vadd.f32 %v208_v15, %v126_v20 }
  0xf3   :  { %v142_v23 = vsel %vm28_vm0, %v140_v21, 0.0  ;;  %v141_v24 = vadd.f32 %v218_v19, %v135_v22 }
  0xf4   :  { %143 = vadd.xlane.f32.xlu0 %v142_v23 }
  0xf5   :  { %v145_v25 = vsel %vm28_vm0, %v141_v24, 0.0 }
  0xf8   :  { %146 = vadd.xlane.f32.xlu0 %v145_v25 }
 0x181   :  { %v144_v26 = vpop.xlane.xlu0 %143 }
 0x182   :  { %v149_v27 = vmul.f32 0.03125, %v144_v26 }
 0x184   :  { %v151_v28 = vsub.f32 %v140_v21, %v149_v27 }
 0x185   :  { %v147_v29 = vpop.xlane.xlu0 %146 }
 0x186   :  { %v150_v30 = vmul.f32 0.03125, %v147_v29  ;;  %v153_v31 = vmul.f32 %v151_v28, %v151_v28 }
 0x188   :  { %v152_v32 = vsub.f32 %v141_v24, %v150_v30  ;;  %v155_v33 = vsel %vm28_vm0, %v153_v31, 0.0 }
 0x189   :  { %156 = vadd.xlane.f32.xlu1 %v155_v33 }
 0x18a   :  { %v154_v34 = vmul.f32 %v152_v32, %v152_v32 }
 0x18c   :  { %v158_v35 = vsel %vm28_vm0, %v154_v34, 0.0 }
 0x18d   :  { %159 = vadd.xlane.f32.xlu1 %v158_v35 }
 0x216   :  { %v157_v36 = vpop.xlane.xlu1 %156 }
 0x217   :  { %v161_v37 = vmul.f32 0.03125, %v157_v36 }
 0x219   :  { %v163_v38 = vadd.f32 1e-12, %v161_v37 }
 0x21a   :  { %v160_v39 = vpop.xlane.xlu1 %159 }
 0x21b   :  { %243 = vrsqrt.f32 %v163_v38  ;;  %v162_v40 = vmul.f32 0.03125, %v160_v39 }
 0x21d   :  { %v164_v41 = vadd.f32 1e-12, %v162_v40 }
 0x21f   :  { %245 = vrsqrt.f32 %v164_v41 }
 0x225   :  { %v244_v42 = vpop.eup %243 }
 0x226   :  { %v167_v44 = vmul.f32 %v244_v42, %v151_v28 }
 0x228   :  { %v176_v46 = vmul.f32 %v209_v43, %v167_v44 }
 0x229   :  { %v246_v47 = vpop.eup %245 }
 0x22a   :  { %v185_v48 = vadd.f32 %v210_v45, %v176_v46  ;;  %v168_v49 = vmul.f32 %v246_v47, %v152_v32 }
 0x22c   :  { %v213_v50 = vpack.c.bf16 %v185_v48, %v185_v48  ;;  %v177_v51 = vmul.f32 %v209_v43, %v168_v49 }
 0x22e   :  { %196 = vst.msk [vmem:[%s331_s6] sm:$0xf] %vm195_vm3, %v213_v50  ;;  %v186_v52 = vadd.f32 %v210_v45, %v177_v51 }
 0x230   :  { %v214_v53 = vpack.c.bf16 %v186_v52, %v186_v52 }
 0x232   :  { %197 = vst.msk [vmem:[%s331_s6 + $0x4] sm:$0xf] %vm195_vm3, %v214_v53 }

// kernel: bert_classifier_forward.23
= control target key start
LH: loop header
LB: loop body
LE: loop exit
PB: predicated region body
PF: predicated region fallthrough
CT: control target
= control target key end

     0   :  { %v237_v1 = vmov 0.0   ;;  %vm238_vm0 = vmmov 0   ;;  %s305_s0 = inlined_call_operand.vmem [shape: bf16[2,32], index: 0, kind: input, shape index: {}]   ;;  %s306_s1 = inlined_call_operand.vmem [shape: bf16[32,32], index: 1, kind: input, shape index: {}]   ;;  %s307_s2 = inlined_call_operand.vmem [shape: f32[1,32], index: 2, kind: input, shape index: {}]   ;;  %s308_s3 = inlined_call_operand.vmem [shape: bf16[32,3], index: 3, kind: input, shape index: {}]   ;;  %s309_s4 = inlined_call_operand.vmem [shape: f32[1,3], index: 4, kind: input, shape index: {}]   ;;  %s310_s5 = inlined_call_operand.hbm [shape: f32[2,3], index: 5, kind: output, shape index: {}]  }
   0x1   :  { %v207_v0 = vld [vmem:[%s306_s1] sm:$0xff]   ;;  %188 = vmatprep.subr.bf16.mxu0 %v237_v1  ;;  %196 = vmatprep.subr.bf16.mxu1 %v237_v1  ;;  %v208_v2 = vld [vmem:[%s306_s1 + $0x8] sm:$0xff]  }
   0x2   :  { %189 = vmatpush3.bf16.msra.mxu0 %v207_v0  ;;  %192 = vmatprep.mubr.msk.bf16.mxu0 %vm238_vm0, %v237_v1 }
   0x3   :  { %190 = vmatprep.subr.bf16.mxu0 %v237_v1  ;;  %200 = vmatprep.mubr.msk.bf16.mxu1 %vm238_vm0, %v237_v1 }
   0x4   :  { %10 = vsyncpa [#allocation3], 0  ;;  %v22_v3 = vld [vmem:[%s305_s0] sm:$0x1]  ;;  %vm46_vm1 = vcmask 261120   ;;  %v210_v5 = vld [vmem:[%s308_s3 + $0x8] sm:$0xff]  }
   0x5   :  { %v209_v4 = vld [vmem:[%s308_s3] sm:$0xff]   ;;  %s239_s3 = smov [#allocation2]   ;;  %vm158_vm2 = vcmask 17408  }
   0x6   :  { %191 = vmatpush3.bf16.msra.mxu0 %v208_v2  ;;  %197 = vmatpush3.bf16.msra.mxu1 %v209_v4  ;;  %v174_v6 = vld [vmem:[%s307_s2] ss:$0 sm:$0xff]  ;;  %s166_s30 = sshll.u32 %s239_s3, 4  ;;  %s167_s30 = int_to_ptr.vmem [resolvable:$true] %s166_s30 }
   0x7   :  { %198 = vmatprep.subr.bf16.mxu1 %v237_v1  ;;  %v178_v14 = vld [vmem:[%s309_s4] ss:$0 sm:$0xff]  ;;  %s213_s2 = scalar_lea.vmem %s167_s30, 32  ;;  %p218_p1 = scmp.lt.s32.totalorder %s167_s30, %s167_s30 }
   0x8   :  { %p214_p0 = scmp.ne.s32.totalorder %s167_s30, %s213_s2  ;;  %p219_p2 = scmp.lt.s32.totalorder %s213_s2, %s213_s2 }
   0x9   :  { %193 = vmatmul.mubr.msk.bf16.vlgmr.msra.gmra.mrb[0].mxu0 %vm46_vm1, %v22_v3 }
   0xa   :  { %199 = vmatpush3.bf16.msra.mxu1 %v210_v5  ;;  %p220_p3 = por %p219_p2, %p218_p1 }
   0xc   :  { %p221_p4 = pnand %p220_p3, %p214_p0 }
  0xdc   :  { %v84_v7 = vpop.f32.mrb[0].mxu0 }
  0xdd   :  { %v85_v8 = vadd.f32 %v174_v6, %v84_v7  ;;  %v194_v9 = vpop.f32.mrb[1].mxu0 }
  0xde   :  { %v87_v10 = vpop.f32.mrb[2].mxu0 }
  0xdf   :  { %211 = vtanh.f32 %v85_v8  ;;  %v195_v11 = vpop.f32.mrb[3].mxu0 }
  0xe9   :  { %v212_v12 = vpop.eup %211 }
  0xea   :  { %v91_v13 = vpack.c.bf16 %v212_v12, %v212_v12 }
  0xec   :  { %201 = vmatmul.mubr.msk.bf16.vlgmr.msra.gmra.mrb[0].mxu1 %vm46_vm1, %v91_v13 }
 0x1bf   :  { %v152_v15 = vpop.f32.mrb[0].mxu1 }
 0x1c0   :  { %v153_v16 = vadd.f32 %v178_v14, %v152_v15  ;;  %v202_v17 = vpop.f32.mrb[1].mxu1 }
 0x1c1   :  { %v155_v18 = vpop.f32.mrb[2].mxu1 }
 0x1c2   :  { %v203_v19 = vpop.f32.mrb[3].mxu1  ;;  %159 = vst.msk [vmem:[#allocation2] sm:$0x3] %vm158_vm2, %v153_v16 }
 0x1c3   :  { %224 = shalt.err (!%p221_p4)
}
 0x1c4   :  { %s225_s4 = scalar_lea.hbm %s310_s5, 32 }
 0x1c5   :  { %p226_p5 = scmp.ne.s32.totalorder %s310_s5, %s225_s4  ;;  %p229_p6 = scmp.lt.u32.totalorder %s225_s4, %s310_s5 }
 0x1c7   :  { %p231_p7 = pnand %p229_p6, %p226_p5 }
 0x1c9   :  { %234 = shalt.err (!%p231_p7)
}
 0x1ca   :  { %169 = dma.vmem_to_hbm [thread:$0]  %s167_s30, 32, %s310_s5, [#allocation3]  }
 0x1cb   :  { %235 = dma.done.wait [#allocation3], 32  }
 0x1cc   :  { %236 = vsyncadd [#allocation3], 4294967264 }
 0x1cd   :  { %173 = vsyncpa [#allocation3], 1 }

</bundles_post_ra>
